<compile_context>
chip_gen: v6e
topology: v6e:2x2x1
jax: 0.10.0
libtpu: 0.0.40
codegen_flags: <defaults>
</compile_context>

<pallas_src>
import functools

import jax
import jax.numpy as jnp
from jax import lax
from jax.experimental import pallas as pl
from jax.experimental.pallas import tpu as pltpu


def lstm_head_kernel(xflat_ref, h0_ref, c0_ref,
                     wih_ref, whh_ref, bias_ref,
                     w1_ref, b1_ref, w2_ref, b2_ref,
                     out_ref, gx_a, gx_b, hbuf):
    """Multi-layer LSTM over time + MLP head, fully VMEM-resident.

    xflat_ref: (T*B, H) bf16     embedded tokens, time-major flattened
    h0_ref / c0_ref: (L, B, H) f32   initial states
    wih_ref / whh_ref: (L, H, 4H) bf16   pre-transposed LSTM weights (i,f,g,o)
    bias_ref: (L, 1, 4H) f32     pre-summed b_ih + b_hh
    w1_ref: (H, 2H) bf16, b1_ref: (1, 2H) f32    fc1
    w2_ref: (2H, C) bf16, b2_ref: (1, C) f32     fc2
    out_ref: (B, C) f32          softmax probabilities
    gx_a / gx_b: (T*B, 4H) f32   hoisted input-projection buffers (ping-pong)
    hbuf: (T*B, H) f32           per-layer hidden outputs (feeds next layer's
                                 batched input projection)
    """
    TB, H = xflat_ref.shape
    L, B, _ = h0_ref.shape
    T = TB // B
    G = 4 * H

    # Per-lane constants that fold the 4 gate nonlinearities into ONE full-vreg
    # tanh pass:  sigmoid(x) = 0.5*tanh(0.5*x) + 0.5  (i/f/o lane ranges),
    #             tanh(x)    = 1.0*tanh(1.0*x) + 0.0  (g lane range).
    # Built once at full (B, 4H) width so no broadcast is re-emitted per step.
    lane = lax.broadcasted_iota(jnp.int32, (B, G), 1)
    is_g = jnp.logical_and(lane >= 2 * H, lane < 3 * H)
    g_scale = jnp.where(is_g, 1.0, 0.5).astype(jnp.float32)     # (B, 4H)
    g_shift = jnp.where(is_g, 0.0, 0.5).astype(jnp.float32)     # (B, 4H)

    # ---- Layer-0 input projection: ONE well-shaped MXU matmul for the whole
    # sequence, hoisted off the recurrent critical path.
    gx_a[...] = (jnp.dot(xflat_ref[...], wih_ref[0],
                         preferred_element_type=jnp.float32) + bias_ref[0])

    # ---- Recurrence over layers (static) and time (statically unrolled).
    gx_bufs = (gx_a, gx_b)
    h_last = h0_ref[0].astype(jnp.bfloat16)
    for l in range(L):
        cur = gx_bufs[l % 2]
        nxt = gx_bufs[(l + 1) % 2]
        has_next = (l + 1) < L
        whh_l = whh_ref[l]                      # (H, 4H) bf16, loop-invariant
        h = h0_ref[l].astype(jnp.bfloat16)      # bf16 carry
        c = c0_ref[l]                           # f32 carry
        for t in range(T):                      # static: all offsets constant
            # Single MXU matmul on the serial dependency chain.
            gates = (jnp.dot(h, whh_l, preferred_element_type=jnp.float32)
                     + cur[pl.ds(t * B, B), :])                  # (B, 4H) f32
            # One full-vreg tanh (EUP) + cheap VPU affine instead of 4 partial
            # transcendental passes.
            act = g_scale * jnp.tanh(gates * g_scale) + g_shift
            i_g = act[:, 0 * H:1 * H]
            f_g = act[:, 1 * H:2 * H]
            g_g = act[:, 2 * H:3 * H]
            o_g = act[:, 3 * H:4 * H]
            c = f_g * c + i_g * g_g
            h_f32 = o_g * jnp.tanh(c)
            h = h_f32.astype(jnp.bfloat16)      # single cast/step (reused above)
            if has_next:
                # Only a store on the chain; the matmul is batched below.
                hbuf[pl.ds(t * B, B), :] = h_f32
        if has_next:
            # Whole next-layer input projection in ONE batched matmul, between
            # the serial loops (slack MXU work, off the critical path).
            nxt[...] = (jnp.dot(hbuf[...].astype(jnp.bfloat16), wih_ref[l + 1],
                                preferred_element_type=jnp.float32)
                        + bias_ref[l + 1])
        h_last = h

    # ---- Head on out[:, -1, :] of the top layer (== h_last). Dropouts are
    # identity at inference.
    z1 = (jnp.dot(h_last, w1_ref[...], preferred_element_type=jnp.float32)
          + b1_ref[...])
    z1 = jnp.maximum(z1, 0.0)                                    # relu_
    logits = (jnp.dot(z1.astype(jnp.bfloat16), w2_ref[...],
                      preferred_element_type=jnp.float32) + b2_ref[...])
    m = jnp.max(logits, axis=-1, keepdims=True)
    e = jnp.exp(logits - m)
    out_ref[...] = e / jnp.sum(e, axis=-1, keepdims=True)        # exact softmax


def simple_sequence_lstm_forward(x_tokens, params, *, hidden_dim, lstm_layers,
                                 target_size, seed_hc=123):
    B, T = x_tokens.shape
    H, L, C = hidden_dim, lstm_layers, target_size

    # Embedding lookup (frozen, pretrained) — glue in plain JAX.
    emb = jnp.take(params["embedding"], x_tokens, axis=0)        # (B, T, H)
    # Time-major, flattened so the layer-0 projection is a single matmul.
    xflat = (jnp.transpose(emb, (1, 0, 2))
             .reshape(T * B, H).astype(jnp.bfloat16))            # (T*B, H)

    # torch.nn.init.xavier_normal_ on zeros((L, B, H)) — made deterministic.
    # PyTorch fan calc for a 3-D tensor: fan_in = B*H, fan_out = L*H.
    std = (2.0 / (B * H + L * H)) ** 0.5
    kh, kc = jax.random.split(jax.random.PRNGKey(seed_hc))
    h0 = std * jax.random.normal(kh, (L, B, H), jnp.float32)
    c0 = std * jax.random.normal(kc, (L, B, H), jnp.float32)

    # Pre-sum the two LSTM biases so the kernel sees one bias per layer.
    lstm_bias = params["b_ih"] + params["b_hh"]                  # (L, 1, 4H)

    vmem = pl.BlockSpec(memory_space=pltpu.MemorySpace.VMEM)
    out = pl.pallas_call(
        lstm_head_kernel,
        out_shape=jax.ShapeDtypeStruct((B, C), jnp.float32),
        in_specs=[vmem] * 10,
        out_specs=vmem,
        scratch_shapes=[pltpu.VMEM((T * B, 4 * H), jnp.float32),   # gx_a
                        pltpu.VMEM((T * B, 4 * H), jnp.float32),   # gx_b
                        pltpu.VMEM((T * B, H), jnp.float32)],      # hbuf
    )(xflat, h0, c0,
      params["w_ih_T"], params["w_hh_T"], lstm_bias,
      params["w1_T"], params["b1"], params["w2_T"], params["b2"])
    return out


def make_params(key, *, vocab, hidden_dim, lstm_layers, target_size, padding_idx=0):
    H, L, C = hidden_dim, lstm_layers, target_size
    keys = jax.random.split(key, 9)   # independent draws for every tensor

    # Frozen "pretrained" embedding matrix (vocab, H); zero row at padding_idx.
    embedding = jax.random.normal(keys[0], (vocab, H), jnp.float32)
    embedding = embedding.at[padding_idx].set(0.0)

    k = 1.0 / (H ** 0.5)  # PyTorch LSTM init bound
    w_ih = jax.random.uniform(keys[1], (L, 4 * H, H), jnp.float32, -k, k)
    w_hh = jax.random.uniform(keys[2], (L, 4 * H, H), jnp.float32, -k, k)
    b_ih = jax.random.uniform(keys[3], (L, 1, 4 * H), jnp.float32, -k, k)
    b_hh = jax.random.uniform(keys[4], (L, 1, 4 * H), jnp.float32, -k, k)

    k1 = 1.0 / (H ** 0.5)
    w1 = jax.random.uniform(keys[5], (2 * H, H), jnp.float32, -k1, k1)   # fc1 (out,in)
    b1 = jax.random.uniform(keys[6], (1, 2 * H), jnp.float32, -k1, k1)
    k2 = 1.0 / ((2 * H) ** 0.5)
    w2 = jax.random.uniform(keys[7], (C, 2 * H), jnp.float32, -k2, k2)   # fc2 (out,in)
    b2 = jax.random.uniform(keys[8], (1, C), jnp.float32, -k2, k2)

    return {
        "embedding": embedding,
        # bf16 weights (MXU-native); f32 accumulation in-kernel.
        "w_ih_T": jnp.transpose(w_ih, (0, 2, 1)).astype(jnp.bfloat16),   # (L, H, 4H)
        "w_hh_T": jnp.transpose(w_hh, (0, 2, 1)).astype(jnp.bfloat16),   # (L, H, 4H)
        "b_ih": b_ih,                                                    # (L, 1, 4H)
        "b_hh": b_hh,                                                    # (L, 1, 4H)
        "w1_T": jnp.transpose(w1).astype(jnp.bfloat16),                  # (H, 2H)
        "b1": b1,                                                        # (1, 2H)
        "w2_T": jnp.transpose(w2).astype(jnp.bfloat16),                  # (2H, C)
        "b2": b2,                                                        # (1, C)
    }


if __name__ == "__main__":
    # Small shapes consistent with the module's forward.
    B, T, H, L, C, VOCAB = 2, 8, 32, 2, 8, 50

    key = jax.random.PRNGKey(0)
    k_params, k_tokens = jax.random.split(key)
    params = make_params(k_params, vocab=VOCAB, hidden_dim=H,
                         lstm_layers=L, target_size=C, padding_idx=0)
    x = jax.random.randint(k_tokens, (B, T), 1, VOCAB, dtype=jnp.int32)

    fwd = jax.jit(functools.partial(simple_sequence_lstm_forward,
                                    hidden_dim=H, lstm_layers=L, target_size=C))
    out = fwd(x, params)
    out = jax.block_until_ready(out)

    assert out.shape == (B, C)
    assert bool(jnp.all(jnp.isfinite(out)))
    # softmax rows must sum to 1 (exact divide in f32)
    assert bool(jnp.all(jnp.abs(jnp.sum(out, axis=-1) - 1.0) < 1e-5))
    print("KERNEL_OK")
</pallas_src>

<mosaic_0001>
module attributes {stable_mosaic.version = 11 : i64} {
  func.func @lstm_head_kernel(%arg0: memref<16x32xbf16, #tpu.memory_space<vmem>>, %arg1: memref<2x2x32xf32, #tpu.memory_space<vmem>>, %arg2: memref<2x2x32xf32, #tpu.memory_space<vmem>>, %arg3: memref<2x32x128xbf16, #tpu.memory_space<vmem>>, %arg4: memref<2x32x128xbf16, #tpu.memory_space<vmem>>, %arg5: memref<2x1x128xf32, #tpu.memory_space<vmem>>, %arg6: memref<32x64xbf16, #tpu.memory_space<vmem>>, %arg7: memref<1x64xf32, #tpu.memory_space<vmem>>, %arg8: memref<64x8xbf16, #tpu.memory_space<vmem>>, %arg9: memref<1x8xf32, #tpu.memory_space<vmem>>, %arg10: memref<2x8xf32, #tpu.memory_space<vmem>>, %arg11: memref<16x128xf32, #tpu.memory_space<vmem>>, %arg12: memref<16x128xf32, #tpu.memory_space<vmem>>, %arg13: memref<16x32xf32, #tpu.memory_space<vmem>>) attributes {dimension_semantics = [], scalar_prefetch = 0 : i64, scratch_operands = 3 : i64, tpu.core_type = #tpu.core_type<tc>} {
    %0 = tpu.iota {dimensions = array<i32: 1>} : vector<2x128xi32>
    %c64_i32 = arith.constant 64 : i32
    %1 = vector.broadcast %c64_i32 : i32 to vector<2x128xi32>
    %2 = arith.cmpi sge, %0, %1 : vector<2x128xi32>
    %c96_i32 = arith.constant 96 : i32
    %3 = vector.broadcast %c96_i32 : i32 to vector<2x128xi32>
    %4 = arith.cmpi slt, %0, %3 : vector<2x128xi32>
    %5 = arith.andi %2, %4 : vector<2x128xi1>
    %cst = arith.constant 1.000000e+00 : f32
    %cst_0 = arith.constant 5.000000e-01 : f32
    %6 = vector.broadcast %cst : f32 to vector<2x128xf32>
    %7 = vector.broadcast %cst_0 : f32 to vector<2x128xf32>
    %8 = arith.select %5, %6, %7 : vector<2x128xi1>, vector<2x128xf32>
    %cst_1 = arith.constant 0.000000e+00 : f32
    %cst_2 = arith.constant 5.000000e-01 : f32
    %9 = vector.broadcast %cst_1 : f32 to vector<2x128xf32>
    %10 = vector.broadcast %cst_2 : f32 to vector<2x128xf32>
    %11 = arith.select %5, %9, %10 : vector<2x128xi1>, vector<2x128xf32>
    %c0 = arith.constant 0 : index
    %c0_3 = arith.constant 0 : index
    %12 = vector.load %arg0[%c0, %c0_3] : memref<16x32xbf16, #tpu.memory_space<vmem>>, vector<16x32xbf16>
    %c0_4 = arith.constant 0 : index
    %c0_5 = arith.constant 0 : index
    %c0_6 = arith.constant 0 : index
    %13 = vector.load %arg3[%c0_4, %c0_5, %c0_6] : memref<2x32x128xbf16, #tpu.memory_space<vmem>>, vector<1x32x128xbf16>
    %14 = vector.shape_cast %13 : vector<1x32x128xbf16> to vector<32x128xbf16>
    %cst_7 = arith.constant dense<0.000000e+00> : vector<16x128xf32>
    %15 = tpu.matmul %12, %14, %cst_7 {dimension_numbers = #tpu.dot_dimension_numbers<[1], [0], [0], [1], [0, 0, 1, 1], [], []>} : vector<16x32xbf16>, vector<32x128xbf16>, vector<16x128xf32> -> vector<16x128xf32>
    %c0_8 = arith.constant 0 : index
    %c0_9 = arith.constant 0 : index
    %c0_10 = arith.constant 0 : index
    %16 = vector.load %arg5[%c0_8, %c0_9, %c0_10] : memref<2x1x128xf32, #tpu.memory_space<vmem>>, vector<1x1x128xf32>
    %17 = vector.shape_cast %16 : vector<1x1x128xf32> to vector<1x128xf32>
    %18 = vector.broadcast %17 : vector<1x128xf32> to vector<16x128xf32>
    %19 = arith.addf %15, %18 : vector<16x128xf32>
    %c0_11 = arith.constant 0 : index
    %c0_12 = arith.constant 0 : index
    %20 = vector.load %arg11[%c0_11, %c0_12] : memref<16x128xf32, #tpu.memory_space<vmem>>, vector<16x128xf32>
    tpu.vector_store %arg11[%c0_11, %c0_12], %19 {strides = array<i32>} : memref<16x128xf32, #tpu.memory_space<vmem>>, vector<16x128xf32>,
    %c0_13 = arith.constant 0 : index
    %c0_14 = arith.constant 0 : index
    %c0_15 = arith.constant 0 : index
    %21 = vector.load %arg4[%c0_13, %c0_14, %c0_15] : memref<2x32x128xbf16, #tpu.memory_space<vmem>>, vector<1x32x128xbf16>
    %22 = vector.shape_cast %21 : vector<1x32x128xbf16> to vector<32x128xbf16>
    %c0_16 = arith.constant 0 : index
    %c0_17 = arith.constant 0 : index
    %c0_18 = arith.constant 0 : index
    %23 = vector.load %arg1[%c0_16, %c0_17, %c0_18] : memref<2x2x32xf32, #tpu.memory_space<vmem>>, vector<1x2x32xf32>
    %24 = vector.shape_cast %23 : vector<1x2x32xf32> to vector<2x32xf32>
    %25 = arith.truncf %24 : vector<2x32xf32> to vector<2x32xbf16>
    %c0_19 = arith.constant 0 : index
    %c0_20 = arith.constant 0 : index
    %c0_21 = arith.constant 0 : index
    %26 = vector.load %arg2[%c0_19, %c0_20, %c0_21] : memref<2x2x32xf32, #tpu.memory_space<vmem>>, vector<1x2x32xf32>
    %27 = vector.shape_cast %26 : vector<1x2x32xf32> to vector<2x32xf32>
    %cst_22 = arith.constant dense<0.000000e+00> : vector<2x128xf32>
    %28 = tpu.matmul %25, %22, %cst_22 {dimension_numbers = #tpu.dot_dimension_numbers<[1], [0], [0], [1], [0, 0, 1, 1], [], []>} : vector<2x32xbf16>, vector<32x128xbf16>, vector<2x128xf32> -> vector<2x128xf32>
    %c0_23 = arith.constant 0 : index
    %c0_24 = arith.constant 0 : index
    %29 = vector.load %arg11[%c0_23, %c0_24] : memref<16x128xf32, #tpu.memory_space<vmem>>, vector<2x128xf32>
    %30 = arith.addf %28, %29 : vector<2x128xf32>
    %31 = arith.mulf %30, %8 : vector<2x128xf32>
    %32 = math.tanh %31 : vector<2x128xf32>
    %33 = arith.mulf %8, %32 : vector<2x128xf32>
    %34 = arith.addf %33, %11 : vector<2x128xf32>
    %35 = vector.extract_strided_slice %34 {offsets = [0, 0], sizes = [2, 32], strides = [1, 1]} : vector<2x128xf32> to vector<2x32xf32>
    %36 = vector.extract_strided_slice %34 {offsets = [0, 32], sizes = [2, 32], strides = [1, 1]} : vector<2x128xf32> to vector<2x32xf32>
    %37 = vector.extract_strided_slice %34 {offsets = [0, 64], sizes = [2, 32], strides = [1, 1]} : vector<2x128xf32> to vector<2x32xf32>
    %38 = vector.extract_strided_slice %34 {offsets = [0, 96], sizes = [2, 32], strides = [1, 1]} : vector<2x128xf32> to vector<2x32xf32>
    %39 = arith.mulf %36, %27 : vector<2x32xf32>
    %40 = arith.mulf %35, %37 : vector<2x32xf32>
    %41 = arith.addf %39, %40 : vector<2x32xf32>
    %42 = math.tanh %41 : vector<2x32xf32>
    %43 = arith.mulf %38, %42 : vector<2x32xf32>
    %44 = arith.truncf %43 : vector<2x32xf32> to vector<2x32xbf16>
    %c0_25 = arith.constant 0 : index
    %c0_26 = arith.constant 0 : index
    %45 = vector.load %arg13[%c0_25, %c0_26] : memref<16x32xf32, #tpu.memory_space<vmem>>, vector<2x32xf32>
    tpu.vector_store %arg13[%c0_25, %c0_26], %43 {strides = array<i32>} : memref<16x32xf32, #tpu.memory_space<vmem>>, vector<2x32xf32>,
    %cst_27 = arith.constant dense<0.000000e+00> : vector<2x128xf32>
    %46 = tpu.matmul %44, %22, %cst_27 {dimension_numbers = #tpu.dot_dimension_numbers<[1], [0], [0], [1], [0, 0, 1, 1], [], []>} : vector<2x32xbf16>, vector<32x128xbf16>, vector<2x128xf32> -> vector<2x128xf32>
    %c2 = arith.constant 2 : index
    %c0_28 = arith.constant 0 : index
    %47 = vector.load %arg11[%c2, %c0_28] : memref<16x128xf32, #tpu.memory_space<vmem>>, vector<2x128xf32>
    %48 = arith.addf %46, %47 : vector<2x128xf32>
    %49 = arith.mulf %48, %8 : vector<2x128xf32>
    %50 = math.tanh %49 : vector<2x128xf32>
    %51 = arith.mulf %8, %50 : vector<2x128xf32>
    %52 = arith.addf %51, %11 : vector<2x128xf32>
    %53 = vector.extract_strided_slice %52 {offsets = [0, 0], sizes = [2, 32], strides = [1, 1]} : vector<2x128xf32> to vector<2x32xf32>
    %54 = vector.extract_strided_slice %52 {offsets = [0, 32], sizes = [2, 32], strides = [1, 1]} : vector<2x128xf32> to vector<2x32xf32>
    %55 = vector.extract_strided_slice %52 {offsets = [0, 64], sizes = [2, 32], strides = [1, 1]} : vector<2x128xf32> to vector<2x32xf32>
    %56 = vector.extract_strided_slice %52 {offsets = [0, 96], sizes = [2, 32], strides = [1, 1]} : vector<2x128xf32> to vector<2x32xf32>
    %57 = arith.mulf %54, %41 : vector<2x32xf32>
    %58 = arith.mulf %53, %55 : vector<2x32xf32>
    %59 = arith.addf %57, %58 : vector<2x32xf32>
    %60 = math.tanh %59 : vector<2x32xf32>
    %61 = arith.mulf %56, %60 : vector<2x32xf32>
    %62 = arith.truncf %61 : vector<2x32xf32> to vector<2x32xbf16>
    %c2_29 = arith.constant 2 : index
    %c0_30 = arith.constant 0 : index
    %63 = vector.load %arg13[%c2_29, %c0_30] : memref<16x32xf32, #tpu.memory_space<vmem>>, vector<2x32xf32>
    tpu.vector_store %arg13[%c2_29, %c0_30], %61 {strides = array<i32>} : memref<16x32xf32, #tpu.memory_space<vmem>>, vector<2x32xf32>,
    %cst_31 = arith.constant dense<0.000000e+00> : vector<2x128xf32>
    %64 = tpu.matmul %62, %22, %cst_31 {dimension_numbers = #tpu.dot_dimension_numbers<[1], [0], [0], [1], [0, 0, 1, 1], [], []>} : vector<2x32xbf16>, vector<32x128xbf16>, vector<2x128xf32> -> vector<2x128xf32>
    %c4 = arith.constant 4 : index
    %c0_32 = arith.constant 0 : index
    %65 = vector.load %arg11[%c4, %c0_32] : memref<16x128xf32, #tpu.memory_space<vmem>>, vector<2x128xf32>
    %66 = arith.addf %64, %65 : vector<2x128xf32>
    %67 = arith.mulf %66, %8 : vector<2x128xf32>
    %68 = math.tanh %67 : vector<2x128xf32>
    %69 = arith.mulf %8, %68 : vector<2x128xf32>
    %70 = arith.addf %69, %11 : vector<2x128xf32>
    %71 = vector.extract_strided_slice %70 {offsets = [0, 0], sizes = [2, 32], strides = [1, 1]} : vector<2x128xf32> to vector<2x32xf32>
    %72 = vector.extract_strided_slice %70 {offsets = [0, 32], sizes = [2, 32], strides = [1, 1]} : vector<2x128xf32> to vector<2x32xf32>
    %73 = vector.extract_strided_slice %70 {offsets = [0, 64], sizes = [2, 32], strides = [1, 1]} : vector<2x128xf32> to vector<2x32xf32>
    %74 = vector.extract_strided_slice %70 {offsets = [0, 96], sizes = [2, 32], strides = [1, 1]} : vector<2x128xf32> to vector<2x32xf32>
    %75 = arith.mulf %72, %59 : vector<2x32xf32>
    %76 = arith.mulf %71, %73 : vector<2x32xf32>
    %77 = arith.addf %75, %76 : vector<2x32xf32>
    %78 = math.tanh %77 : vector<2x32xf32>
    %79 = arith.mulf %74, %78 : vector<2x32xf32>
    %80 = arith.truncf %79 : vector<2x32xf32> to vector<2x32xbf16>
    %c4_33 = arith.constant 4 : index
    %c0_34 = arith.constant 0 : index
    %81 = vector.load %arg13[%c4_33, %c0_34] : memref<16x32xf32, #tpu.memory_space<vmem>>, vector<2x32xf32>
    tpu.vector_store %arg13[%c4_33, %c0_34], %79 {strides = array<i32>} : memref<16x32xf32, #tpu.memory_space<vmem>>, vector<2x32xf32>,
    %cst_35 = arith.constant dense<0.000000e+00> : vector<2x128xf32>
    %82 = tpu.matmul %80, %22, %cst_35 {dimension_numbers = #tpu.dot_dimension_numbers<[1], [0], [0], [1], [0, 0, 1, 1], [], []>} : vector<2x32xbf16>, vector<32x128xbf16>, vector<2x128xf32> -> vector<2x128xf32>
    %c6 = arith.constant 6 : index
    %c0_36 = arith.constant 0 : index
    %83 = vector.load %arg11[%c6, %c0_36] : memref<16x128xf32, #tpu.memory_space<vmem>>, vector<2x128xf32>
    %84 = arith.addf %82, %83 : vector<2x128xf32>
    %85 = arith.mulf %84, %8 : vector<2x128xf32>
    %86 = math.tanh %85 : vector<2x128xf32>
    %87 = arith.mulf %8, %86 : vector<2x128xf32>
    %88 = arith.addf %87, %11 : vector<2x128xf32>
    %89 = vector.extract_strided_slice %88 {offsets = [0, 0], sizes = [2, 32], strides = [1, 1]} : vector<2x128xf32> to vector<2x32xf32>
    %90 = vector.extract_strided_slice %88 {offsets = [0, 32], sizes = [2, 32], strides = [1, 1]} : vector<2x128xf32> to vector<2x32xf32>
    %91 = vector.extract_strided_slice %88 {offsets = [0, 64], sizes = [2, 32], strides = [1, 1]} : vector<2x128xf32> to vector<2x32xf32>
    %92 = vector.extract_strided_slice %88 {offsets = [0, 96], sizes = [2, 32], strides = [1, 1]} : vector<2x128xf32> to vector<2x32xf32>
    %93 = arith.mulf %90, %77 : vector<2x32xf32>
    %94 = arith.mulf %89, %91 : vector<2x32xf32>
    %95 = arith.addf %93, %94 : vector<2x32xf32>
    %96 = math.tanh %95 : vector<2x32xf32>
    %97 = arith.mulf %92, %96 : vector<2x32xf32>
    %98 = arith.truncf %97 : vector<2x32xf32> to vector<2x32xbf16>
    %c6_37 = arith.constant 6 : index
    %c0_38 = arith.constant 0 : index
    %99 = vector.load %arg13[%c6_37, %c0_38] : memref<16x32xf32, #tpu.memory_space<vmem>>, vector<2x32xf32>
    tpu.vector_store %arg13[%c6_37, %c0_38], %97 {strides = array<i32>} : memref<16x32xf32, #tpu.memory_space<vmem>>, vector<2x32xf32>,
    %cst_39 = arith.constant dense<0.000000e+00> : vector<2x128xf32>
    %100 = tpu.matmul %98, %22, %cst_39 {dimension_numbers = #tpu.dot_dimension_numbers<[1], [0], [0], [1], [0, 0, 1, 1], [], []>} : vector<2x32xbf16>, vector<32x128xbf16>, vector<2x128xf32> -> vector<2x128xf32>
    %c8 = arith.constant 8 : index
    %c0_40 = arith.constant 0 : index
    %101 = vector.load %arg11[%c8, %c0_40] : memref<16x128xf32, #tpu.memory_space<vmem>>, vector<2x128xf32>
    %102 = arith.addf %100, %101 : vector<2x128xf32>
    %103 = arith.mulf %102, %8 : vector<2x128xf32>
    %104 = math.tanh %103 : vector<2x128xf32>
    %105 = arith.mulf %8, %104 : vector<2x128xf32>
    %106 = arith.addf %105, %11 : vector<2x128xf32>
    %107 = vector.extract_strided_slice %106 {offsets = [0, 0], sizes = [2, 32], strides = [1, 1]} : vector<2x128xf32> to vector<2x32xf32>
    %108 = vector.extract_strided_slice %106 {offsets = [0, 32], sizes = [2, 32], strides = [1, 1]} : vector<2x128xf32> to vector<2x32xf32>
    %109 = vector.extract_strided_slice %106 {offsets = [0, 64], sizes = [2, 32], strides = [1, 1]} : vector<2x128xf32> to vector<2x32xf32>
    %110 = vector.extract_strided_slice %106 {offsets = [0, 96], sizes = [2, 32], strides = [1, 1]} : vector<2x128xf32> to vector<2x32xf32>
    %111 = arith.mulf %108, %95 : vector<2x32xf32>
    %112 = arith.mulf %107, %109 : vector<2x32xf32>
    %113 = arith.addf %111, %112 : vector<2x32xf32>
    %114 = math.tanh %113 : vector<2x32xf32>
    %115 = arith.mulf %110, %114 : vector<2x32xf32>
    %116 = arith.truncf %115 : vector<2x32xf32> to vector<2x32xbf16>
    %c8_41 = arith.constant 8 : index
    %c0_42 = arith.constant 0 : index
    %117 = vector.load %arg13[%c8_41, %c0_42] : memref<16x32xf32, #tpu.memory_space<vmem>>, vector<2x32xf32>
    tpu.vector_store %arg13[%c8_41, %c0_42], %115 {strides = array<i32>} : memref<16x32xf32, #tpu.memory_space<vmem>>, vector<2x32xf32>,
    %cst_43 = arith.constant dense<0.000000e+00> : vector<2x128xf32>
    %118 = tpu.matmul %116, %22, %cst_43 {dimension_numbers = #tpu.dot_dimension_numbers<[1], [0], [0], [1], [0, 0, 1, 1], [], []>} : vector<2x32xbf16>, vector<32x128xbf16>, vector<2x128xf32> -> vector<2x128xf32>
    %c10 = arith.constant 10 : index
    %c0_44 = arith.constant 0 : index
    %119 = vector.load %arg11[%c10, %c0_44] : memref<16x128xf32, #tpu.memory_space<vmem>>, vector<2x128xf32>
    %120 = arith.addf %118, %119 : vector<2x128xf32>
    %121 = arith.mulf %120, %8 : vector<2x128xf32>
    %122 = math.tanh %121 : vector<2x128xf32>
    %123 = arith.mulf %8, %122 : vector<2x128xf32>
    %124 = arith.addf %123, %11 : vector<2x128xf32>
    %125 = vector.extract_strided_slice %124 {offsets = [0, 0], sizes = [2, 32], strides = [1, 1]} : vector<2x128xf32> to vector<2x32xf32>
    %126 = vector.extract_strided_slice %124 {offsets = [0, 32], sizes = [2, 32], strides = [1, 1]} : vector<2x128xf32> to vector<2x32xf32>
    %127 = vector.extract_strided_slice %124 {offsets = [0, 64], sizes = [2, 32], strides = [1, 1]} : vector<2x128xf32> to vector<2x32xf32>
    %128 = vector.extract_strided_slice %124 {offsets = [0, 96], sizes = [2, 32], strides = [1, 1]} : vector<2x128xf32> to vector<2x32xf32>
    %129 = arith.mulf %126, %113 : vector<2x32xf32>
    %130 = arith.mulf %125, %127 : vector<2x32xf32>
    %131 = arith.addf %129, %130 : vector<2x32xf32>
    %132 = math.tanh %131 : vector<2x32xf32>
    %133 = arith.mulf %128, %132 : vector<2x32xf32>
    %134 = arith.truncf %133 : vector<2x32xf32> to vector<2x32xbf16>
    %c10_45 = arith.constant 10 : index
    %c0_46 = arith.constant 0 : index
    %135 = vector.load %arg13[%c10_45, %c0_46] : memref<16x32xf32, #tpu.memory_space<vmem>>, vector<2x32xf32>
    tpu.vector_store %arg13[%c10_45, %c0_46], %133 {strides = array<i32>} : memref<16x32xf32, #tpu.memory_space<vmem>>, vector<2x32xf32>,
    %cst_47 = arith.constant dense<0.000000e+00> : vector<2x128xf32>
    %136 = tpu.matmul %134, %22, %cst_47 {dimension_numbers = #tpu.dot_dimension_numbers<[1], [0], [0], [1], [0, 0, 1, 1], [], []>} : vector<2x32xbf16>, vector<32x128xbf16>, vector<2x128xf32> -> vector<2x128xf32>
    %c12 = arith.constant 12 : index
    %c0_48 = arith.constant 0 : index
    %137 = vector.load %arg11[%c12, %c0_48] : memref<16x128xf32, #tpu.memory_space<vmem>>, vector<2x128xf32>
    %138 = arith.addf %136, %137 : vector<2x128xf32>
    %139 = arith.mulf %138, %8 : vector<2x128xf32>
    %140 = math.tanh %139 : vector<2x128xf32>
    %141 = arith.mulf %8, %140 : vector<2x128xf32>
    %142 = arith.addf %141, %11 : vector<2x128xf32>
    %143 = vector.extract_strided_slice %142 {offsets = [0, 0], sizes = [2, 32], strides = [1, 1]} : vector<2x128xf32> to vector<2x32xf32>
    %144 = vector.extract_strided_slice %142 {offsets = [0, 32], sizes = [2, 32], strides = [1, 1]} : vector<2x128xf32> to vector<2x32xf32>
    %145 = vector.extract_strided_slice %142 {offsets = [0, 64], sizes = [2, 32], strides = [1, 1]} : vector<2x128xf32> to vector<2x32xf32>
    %146 = vector.extract_strided_slice %142 {offsets = [0, 96], sizes = [2, 32], strides = [1, 1]} : vector<2x128xf32> to vector<2x32xf32>
    %147 = arith.mulf %144, %131 : vector<2x32xf32>
    %148 = arith.mulf %143, %145 : vector<2x32xf32>
    %149 = arith.addf %147, %148 : vector<2x32xf32>
    %150 = math.tanh %149 : vector<2x32xf32>
    %151 = arith.mulf %146, %150 : vector<2x32xf32>
    %152 = arith.truncf %151 : vector<2x32xf32> to vector<2x32xbf16>
    %c12_49 = arith.constant 12 : index
    %c0_50 = arith.constant 0 : index
    %153 = vector.load %arg13[%c12_49, %c0_50] : memref<16x32xf32, #tpu.memory_space<vmem>>, vector<2x32xf32>
    tpu.vector_store %arg13[%c12_49, %c0_50], %151 {strides = array<i32>} : memref<16x32xf32, #tpu.memory_space<vmem>>, vector<2x32xf32>,
    %cst_51 = arith.constant dense<0.000000e+00> : vector<2x128xf32>
    %154 = tpu.matmul %152, %22, %cst_51 {dimension_numbers = #tpu.dot_dimension_numbers<[1], [0], [0], [1], [0, 0, 1, 1], [], []>} : vector<2x32xbf16>, vector<32x128xbf16>, vector<2x128xf32> -> vector<2x128xf32>
    %c14 = arith.constant 14 : index
    %c0_52 = arith.constant 0 : index
    %155 = vector.load %arg11[%c14, %c0_52] : memref<16x128xf32, #tpu.memory_space<vmem>>, vector<2x128xf32>
    %156 = arith.addf %154, %155 : vector<2x128xf32>
    %157 = arith.mulf %156, %8 : vector<2x128xf32>
    %158 = math.tanh %157 : vector<2x128xf32>
    %159 = arith.mulf %8, %158 : vector<2x128xf32>
    %160 = arith.addf %159, %11 : vector<2x128xf32>
    %161 = vector.extract_strided_slice %160 {offsets = [0, 0], sizes = [2, 32], strides = [1, 1]} : vector<2x128xf32> to vector<2x32xf32>
    %162 = vector.extract_strided_slice %160 {offsets = [0, 32], sizes = [2, 32], strides = [1, 1]} : vector<2x128xf32> to vector<2x32xf32>
    %163 = vector.extract_strided_slice %160 {offsets = [0, 64], sizes = [2, 32], strides = [1, 1]} : vector<2x128xf32> to vector<2x32xf32>
    %164 = vector.extract_strided_slice %160 {offsets = [0, 96], sizes = [2, 32], strides = [1, 1]} : vector<2x128xf32> to vector<2x32xf32>
    %165 = arith.mulf %162, %149 : vector<2x32xf32>
    %166 = arith.mulf %161, %163 : vector<2x32xf32>
    %167 = arith.addf %165, %166 : vector<2x32xf32>
    %168 = math.tanh %167 : vector<2x32xf32>
    %169 = arith.mulf %164, %168 : vector<2x32xf32>
    %c14_53 = arith.constant 14 : index
    %c0_54 = arith.constant 0 : index
    %170 = vector.load %arg13[%c14_53, %c0_54] : memref<16x32xf32, #tpu.memory_space<vmem>>, vector<2x32xf32>
    tpu.vector_store %arg13[%c14_53, %c0_54], %169 {strides = array<i32>} : memref<16x32xf32, #tpu.memory_space<vmem>>, vector<2x32xf32>,
    %c0_55 = arith.constant 0 : index
    %c0_56 = arith.constant 0 : index
    %171 = vector.load %arg13[%c0_55, %c0_56] : memref<16x32xf32, #tpu.memory_space<vmem>>, vector<16x32xf32>
    %172 = arith.truncf %171 : vector<16x32xf32> to vector<16x32xbf16>
    %c1 = arith.constant 1 : index
    %c0_57 = arith.constant 0 : index
    %c0_58 = arith.constant 0 : index
    %173 = vector.load %arg3[%c1, %c0_57, %c0_58] : memref<2x32x128xbf16, #tpu.memory_space<vmem>>, vector<1x32x128xbf16>
    %174 = vector.shape_cast %173 : vector<1x32x128xbf16> to vector<32x128xbf16>
    %cst_59 = arith.constant dense<0.000000e+00> : vector<16x128xf32>
    %175 = tpu.matmul %172, %174, %cst_59 {dimension_numbers = #tpu.dot_dimension_numbers<[1], [0], [0], [1], [0, 0, 1, 1], [], []>} : vector<16x32xbf16>, vector<32x128xbf16>, vector<16x128xf32> -> vector<16x128xf32>
    %c1_60 = arith.constant 1 : index
    %c0_61 = arith.constant 0 : index
    %c0_62 = arith.constant 0 : index
    %176 = vector.load %arg5[%c1_60, %c0_61, %c0_62] : memref<2x1x128xf32, #tpu.memory_space<vmem>>, vector<1x1x128xf32>
    %177 = vector.shape_cast %176 : vector<1x1x128xf32> to vector<1x128xf32>
    %178 = vector.broadcast %177 : vector<1x128xf32> to vector<16x128xf32>
    %179 = arith.addf %175, %178 : vector<16x128xf32>
    %c0_63 = arith.constant 0 : index
    %c0_64 = arith.constant 0 : index
    %180 = vector.load %arg12[%c0_63, %c0_64] : memref<16x128xf32, #tpu.memory_space<vmem>>, vector<16x128xf32>
    tpu.vector_store %arg12[%c0_63, %c0_64], %179 {strides = array<i32>} : memref<16x128xf32, #tpu.memory_space<vmem>>, vector<16x128xf32>,
    %c1_65 = arith.constant 1 : index
    %c0_66 = arith.constant 0 : index
    %c0_67 = arith.constant 0 : index
    %181 = vector.load %arg4[%c1_65, %c0_66, %c0_67] : memref<2x32x128xbf16, #tpu.memory_space<vmem>>, vector<1x32x128xbf16>
    %182 = vector.shape_cast %181 : vector<1x32x128xbf16> to vector<32x128xbf16>
    %c1_68 = arith.constant 1 : index
    %c0_69 = arith.constant 0 : index
    %c0_70 = arith.constant 0 : index
    %183 = vector.load %arg1[%c1_68, %c0_69, %c0_70] : memref<2x2x32xf32, #tpu.memory_space<vmem>>, vector<1x2x32xf32>
    %184 = vector.shape_cast %183 : vector<1x2x32xf32> to vector<2x32xf32>
    %185 = arith.truncf %184 : vector<2x32xf32> to vector<2x32xbf16>
    %c1_71 = arith.constant 1 : index
    %c0_72 = arith.constant 0 : index
    %c0_73 = arith.constant 0 : index
    %186 = vector.load %arg2[%c1_71, %c0_72, %c0_73] : memref<2x2x32xf32, #tpu.memory_space<vmem>>, vector<1x2x32xf32>
    %187 = vector.shape_cast %186 : vector<1x2x32xf32> to vector<2x32xf32>
    %cst_74 = arith.constant dense<0.000000e+00> : vector<2x128xf32>
    %188 = tpu.matmul %185, %182, %cst_74 {dimension_numbers = #tpu.dot_dimension_numbers<[1], [0], [0], [1], [0, 0, 1, 1], [], []>} : vector<2x32xbf16>, vector<32x128xbf16>, vector<2x128xf32> -> vector<2x128xf32>
    %c0_75 = arith.constant 0 : index
    %c0_76 = arith.constant 0 : index
    %189 = vector.load %arg12[%c0_75, %c0_76] : memref<16x128xf32, #tpu.memory_space<vmem>>, vector<2x128xf32>
    %190 = arith.addf %188, %189 : vector<2x128xf32>
    %191 = arith.mulf %190, %8 : vector<2x128xf32>
    %192 = math.tanh %191 : vector<2x128xf32>
    %193 = arith.mulf %8, %192 : vector<2x128xf32>
    %194 = arith.addf %193, %11 : vector<2x128xf32>
    %195 = vector.extract_strided_slice %194 {offsets = [0, 0], sizes = [2, 32], strides = [1, 1]} : vector<2x128xf32> to vector<2x32xf32>
    %196 = vector.extract_strided_slice %194 {offsets = [0, 32], sizes = [2, 32], strides = [1, 1]} : vector<2x128xf32> to vector<2x32xf32>
    %197 = vector.extract_strided_slice %194 {offsets = [0, 64], sizes = [2, 32], strides = [1, 1]} : vector<2x128xf32> to vector<2x32xf32>
    %198 = vector.extract_strided_slice %194 {offsets = [0, 96], sizes = [2, 32], strides = [1, 1]} : vector<2x128xf32> to vector<2x32xf32>
    %199 = arith.mulf %196, %187 : vector<2x32xf32>
    %200 = arith.mulf %195, %197 : vector<2x32xf32>
    %201 = arith.addf %199, %200 : vector<2x32xf32>
    %202 = math.tanh %201 : vector<2x32xf32>
    %203 = arith.mulf %198, %202 : vector<2x32xf32>
    %204 = arith.truncf %203 : vector<2x32xf32> to vector<2x32xbf16>
    %cst_77 = arith.constant dense<0.000000e+00> : vector<2x128xf32>
    %205 = tpu.matmul %204, %182, %cst_77 {dimension_numbers = #tpu.dot_dimension_numbers<[1], [0], [0], [1], [0, 0, 1, 1], [], []>} : vector<2x32xbf16>, vector<32x128xbf16>, vector<2x128xf32> -> vector<2x128xf32>
    %c2_78 = arith.constant 2 : index
    %c0_79 = arith.constant 0 : index
    %206 = vector.load %arg12[%c2_78, %c0_79] : memref<16x128xf32, #tpu.memory_space<vmem>>, vector<2x128xf32>
    %207 = arith.addf %205, %206 : vector<2x128xf32>
    %208 = arith.mulf %207, %8 : vector<2x128xf32>
    %209 = math.tanh %208 : vector<2x128xf32>
    %210 = arith.mulf %8, %209 : vector<2x128xf32>
    %211 = arith.addf %210, %11 : vector<2x128xf32>
    %212 = vector.extract_strided_slice %211 {offsets = [0, 0], sizes = [2, 32], strides = [1, 1]} : vector<2x128xf32> to vector<2x32xf32>
    %213 = vector.extract_strided_slice %211 {offsets = [0, 32], sizes = [2, 32], strides = [1, 1]} : vector<2x128xf32> to vector<2x32xf32>
    %214 = vector.extract_strided_slice %211 {offsets = [0, 64], sizes = [2, 32], strides = [1, 1]} : vector<2x128xf32> to vector<2x32xf32>
    %215 = vector.extract_strided_slice %211 {offsets = [0, 96], sizes = [2, 32], strides = [1, 1]} : vector<2x128xf32> to vector<2x32xf32>
    %216 = arith.mulf %213, %201 : vector<2x32xf32>
    %217 = arith.mulf %212, %214 : vector<2x32xf32>
    %218 = arith.addf %216, %217 : vector<2x32xf32>
    %219 = math.tanh %218 : vector<2x32xf32>
    %220 = arith.mulf %215, %219 : vector<2x32xf32>
    %221 = arith.truncf %220 : vector<2x32xf32> to vector<2x32xbf16>
    %cst_80 = arith.constant dense<0.000000e+00> : vector<2x128xf32>
    %222 = tpu.matmul %221, %182, %cst_80 {dimension_numbers = #tpu.dot_dimension_numbers<[1], [0], [0], [1], [0, 0, 1, 1], [], []>} : vector<2x32xbf16>, vector<32x128xbf16>, vector<2x128xf32> -> vector<2x128xf32>
    %c4_81 = arith.constant 4 : index
    %c0_82 = arith.constant 0 : index
    %223 = vector.load %arg12[%c4_81, %c0_82] : memref<16x128xf32, #tpu.memory_space<vmem>>, vector<2x128xf32>
    %224 = arith.addf %222, %223 : vector<2x128xf32>
    %225 = arith.mulf %224, %8 : vector<2x128xf32>
    %226 = math.tanh %225 : vector<2x128xf32>
    %227 = arith.mulf %8, %226 : vector<2x128xf32>
    %228 = arith.addf %227, %11 : vector<2x128xf32>
    %229 = vector.extract_strided_slice %228 {offsets = [0, 0], sizes = [2, 32], strides = [1, 1]} : vector<2x128xf32> to vector<2x32xf32>
    %230 = vector.extract_strided_slice %228 {offsets = [0, 32], sizes = [2, 32], strides = [1, 1]} : vector<2x128xf32> to vector<2x32xf32>
    %231 = vector.extract_strided_slice %228 {offsets = [0, 64], sizes = [2, 32], strides = [1, 1]} : vector<2x128xf32> to vector<2x32xf32>
    %232 = vector.extract_strided_slice %228 {offsets = [0, 96], sizes = [2, 32], strides = [1, 1]} : vector<2x128xf32> to vector<2x32xf32>
    %233 = arith.mulf %230, %218 : vector<2x32xf32>
    %234 = arith.mulf %229, %231 : vector<2x32xf32>
    %235 = arith.addf %233, %234 : vector<2x32xf32>
    %236 = math.tanh %235 : vector<2x32xf32>
    %237 = arith.mulf %232, %236 : vector<2x32xf32>
    %238 = arith.truncf %237 : vector<2x32xf32> to vector<2x32xbf16>
    %cst_83 = arith.constant dense<0.000000e+00> : vector<2x128xf32>
    %239 = tpu.matmul %238, %182, %cst_83 {dimension_numbers = #tpu.dot_dimension_numbers<[1], [0], [0], [1], [0, 0, 1, 1], [], []>} : vector<2x32xbf16>, vector<32x128xbf16>, vector<2x128xf32> -> vector<2x128xf32>
    %c6_84 = arith.constant 6 : index
    %c0_85 = arith.constant 0 : index
    %240 = vector.load %arg12[%c6_84, %c0_85] : memref<16x128xf32, #tpu.memory_space<vmem>>, vector<2x128xf32>
    %241 = arith.addf %239, %240 : vector<2x128xf32>
    %242 = arith.mulf %241, %8 : vector<2x128xf32>
    %243 = math.tanh %242 : vector<2x128xf32>
    %244 = arith.mulf %8, %243 : vector<2x128xf32>
    %245 = arith.addf %244, %11 : vector<2x128xf32>
    %246 = vector.extract_strided_slice %245 {offsets = [0, 0], sizes = [2, 32], strides = [1, 1]} : vector<2x128xf32> to vector<2x32xf32>
    %247 = vector.extract_strided_slice %245 {offsets = [0, 32], sizes = [2, 32], strides = [1, 1]} : vector<2x128xf32> to vector<2x32xf32>
    %248 = vector.extract_strided_slice %245 {offsets = [0, 64], sizes = [2, 32], strides = [1, 1]} : vector<2x128xf32> to vector<2x32xf32>
    %249 = vector.extract_strided_slice %245 {offsets = [0, 96], sizes = [2, 32], strides = [1, 1]} : vector<2x128xf32> to vector<2x32xf32>
    %250 = arith.mulf %247, %235 : vector<2x32xf32>
    %251 = arith.mulf %246, %248 : vector<2x32xf32>
    %252 = arith.addf %250, %251 : vector<2x32xf32>
    %253 = math.tanh %252 : vector<2x32xf32>
    %254 = arith.mulf %249, %253 : vector<2x32xf32>
    %255 = arith.truncf %254 : vector<2x32xf32> to vector<2x32xbf16>
    %cst_86 = arith.constant dense<0.000000e+00> : vector<2x128xf32>
    %256 = tpu.matmul %255, %182, %cst_86 {dimension_numbers = #tpu.dot_dimension_numbers<[1], [0], [0], [1], [0, 0, 1, 1], [], []>} : vector<2x32xbf16>, vector<32x128xbf16>, vector<2x128xf32> -> vector<2x128xf32>
    %c8_87 = arith.constant 8 : index
    %c0_88 = arith.constant 0 : index
    %257 = vector.load %arg12[%c8_87, %c0_88] : memref<16x128xf32, #tpu.memory_space<vmem>>, vector<2x128xf32>
    %258 = arith.addf %256, %257 : vector<2x128xf32>
    %259 = arith.mulf %258, %8 : vector<2x128xf32>
    %260 = math.tanh %259 : vector<2x128xf32>
    %261 = arith.mulf %8, %260 : vector<2x128xf32>
    %262 = arith.addf %261, %11 : vector<2x128xf32>
    %263 = vector.extract_strided_slice %262 {offsets = [0, 0], sizes = [2, 32], strides = [1, 1]} : vector<2x128xf32> to vector<2x32xf32>
    %264 = vector.extract_strided_slice %262 {offsets = [0, 32], sizes = [2, 32], strides = [1, 1]} : vector<2x128xf32> to vector<2x32xf32>
    %265 = vector.extract_strided_slice %262 {offsets = [0, 64], sizes = [2, 32], strides = [1, 1]} : vector<2x128xf32> to vector<2x32xf32>
    %266 = vector.extract_strided_slice %262 {offsets = [0, 96], sizes = [2, 32], strides = [1, 1]} : vector<2x128xf32> to vector<2x32xf32>
    %267 = arith.mulf %264, %252 : vector<2x32xf32>
    %268 = arith.mulf %263, %265 : vector<2x32xf32>
    %269 = arith.addf %267, %268 : vector<2x32xf32>
    %270 = math.tanh %269 : vector<2x32xf32>
    %271 = arith.mulf %266, %270 : vector<2x32xf32>
    %272 = arith.truncf %271 : vector<2x32xf32> to vector<2x32xbf16>
    %cst_89 = arith.constant dense<0.000000e+00> : vector<2x128xf32>
    %273 = tpu.matmul %272, %182, %cst_89 {dimension_numbers = #tpu.dot_dimension_numbers<[1], [0], [0], [1], [0, 0, 1, 1], [], []>} : vector<2x32xbf16>, vector<32x128xbf16>, vector<2x128xf32> -> vector<2x128xf32>
    %c10_90 = arith.constant 10 : index
    %c0_91 = arith.constant 0 : index
    %274 = vector.load %arg12[%c10_90, %c0_91] : memref<16x128xf32, #tpu.memory_space<vmem>>, vector<2x128xf32>
    %275 = arith.addf %273, %274 : vector<2x128xf32>
    %276 = arith.mulf %275, %8 : vector<2x128xf32>
    %277 = math.tanh %276 : vector<2x128xf32>
    %278 = arith.mulf %8, %277 : vector<2x128xf32>
    %279 = arith.addf %278, %11 : vector<2x128xf32>
    %280 = vector.extract_strided_slice %279 {offsets = [0, 0], sizes = [2, 32], strides = [1, 1]} : vector<2x128xf32> to vector<2x32xf32>
    %281 = vector.extract_strided_slice %279 {offsets = [0, 32], sizes = [2, 32], strides = [1, 1]} : vector<2x128xf32> to vector<2x32xf32>
    %282 = vector.extract_strided_slice %279 {offsets = [0, 64], sizes = [2, 32], strides = [1, 1]} : vector<2x128xf32> to vector<2x32xf32>
    %283 = vector.extract_strided_slice %279 {offsets = [0, 96], sizes = [2, 32], strides = [1, 1]} : vector<2x128xf32> to vector<2x32xf32>
    %284 = arith.mulf %281, %269 : vector<2x32xf32>
    %285 = arith.mulf %280, %282 : vector<2x32xf32>
    %286 = arith.addf %284, %285 : vector<2x32xf32>
    %287 = math.tanh %286 : vector<2x32xf32>
    %288 = arith.mulf %283, %287 : vector<2x32xf32>
    %289 = arith.truncf %288 : vector<2x32xf32> to vector<2x32xbf16>
    %cst_92 = arith.constant dense<0.000000e+00> : vector<2x128xf32>
    %290 = tpu.matmul %289, %182, %cst_92 {dimension_numbers = #tpu.dot_dimension_numbers<[1], [0], [0], [1], [0, 0, 1, 1], [], []>} : vector<2x32xbf16>, vector<32x128xbf16>, vector<2x128xf32> -> vector<2x128xf32>
    %c12_93 = arith.constant 12 : index
    %c0_94 = arith.constant 0 : index
    %291 = vector.load %arg12[%c12_93, %c0_94] : memref<16x128xf32, #tpu.memory_space<vmem>>, vector<2x128xf32>
    %292 = arith.addf %290, %291 : vector<2x128xf32>
    %293 = arith.mulf %292, %8 : vector<2x128xf32>
    %294 = math.tanh %293 : vector<2x128xf32>
    %295 = arith.mulf %8, %294 : vector<2x128xf32>
    %296 = arith.addf %295, %11 : vector<2x128xf32>
    %297 = vector.extract_strided_slice %296 {offsets = [0, 0], sizes = [2, 32], strides = [1, 1]} : vector<2x128xf32> to vector<2x32xf32>
    %298 = vector.extract_strided_slice %296 {offsets = [0, 32], sizes = [2, 32], strides = [1, 1]} : vector<2x128xf32> to vector<2x32xf32>
    %299 = vector.extract_strided_slice %296 {offsets = [0, 64], sizes = [2, 32], strides = [1, 1]} : vector<2x128xf32> to vector<2x32xf32>
    %300 = vector.extract_strided_slice %296 {offsets = [0, 96], sizes = [2, 32], strides = [1, 1]} : vector<2x128xf32> to vector<2x32xf32>
    %301 = arith.mulf %298, %286 : vector<2x32xf32>
    %302 = arith.mulf %297, %299 : vector<2x32xf32>
    %303 = arith.addf %301, %302 : vector<2x32xf32>
    %304 = math.tanh %303 : vector<2x32xf32>
    %305 = arith.mulf %300, %304 : vector<2x32xf32>
    %306 = arith.truncf %305 : vector<2x32xf32> to vector<2x32xbf16>
    %cst_95 = arith.constant dense<0.000000e+00> : vector<2x128xf32>
    %307 = tpu.matmul %306, %182, %cst_95 {dimension_numbers = #tpu.dot_dimension_numbers<[1], [0], [0], [1], [0, 0, 1, 1], [], []>} : vector<2x32xbf16>, vector<32x128xbf16>, vector<2x128xf32> -> vector<2x128xf32>
    %c14_96 = arith.constant 14 : index
    %c0_97 = arith.constant 0 : index
    %308 = vector.load %arg12[%c14_96, %c0_97] : memref<16x128xf32, #tpu.memory_space<vmem>>, vector<2x128xf32>
    %309 = arith.addf %307, %308 : vector<2x128xf32>
    %310 = arith.mulf %309, %8 : vector<2x128xf32>
    %311 = math.tanh %310 : vector<2x128xf32>
    %312 = arith.mulf %8, %311 : vector<2x128xf32>
    %313 = arith.addf %312, %11 : vector<2x128xf32>
    %314 = vector.extract_strided_slice %313 {offsets = [0, 0], sizes = [2, 32], strides = [1, 1]} : vector<2x128xf32> to vector<2x32xf32>
    %315 = vector.extract_strided_slice %313 {offsets = [0, 32], sizes = [2, 32], strides = [1, 1]} : vector<2x128xf32> to vector<2x32xf32>
    %316 = vector.extract_strided_slice %313 {offsets = [0, 64], sizes = [2, 32], strides = [1, 1]} : vector<2x128xf32> to vector<2x32xf32>
    %317 = vector.extract_strided_slice %313 {offsets = [0, 96], sizes = [2, 32], strides = [1, 1]} : vector<2x128xf32> to vector<2x32xf32>
    %318 = arith.mulf %315, %303 : vector<2x32xf32>
    %319 = arith.mulf %314, %316 : vector<2x32xf32>
    %320 = arith.addf %318, %319 : vector<2x32xf32>
    %321 = math.tanh %320 : vector<2x32xf32>
    %322 = arith.mulf %317, %321 : vector<2x32xf32>
    %323 = arith.truncf %322 : vector<2x32xf32> to vector<2x32xbf16>
    %c0_98 = arith.constant 0 : index
    %c0_99 = arith.constant 0 : index
    %324 = vector.load %arg6[%c0_98, %c0_99] : memref<32x64xbf16, #tpu.memory_space<vmem>>, vector<32x64xbf16>
    %cst_100 = arith.constant dense<0.000000e+00> : vector<2x64xf32>
    %325 = tpu.matmul %323, %324, %cst_100 {dimension_numbers = #tpu.dot_dimension_numbers<[1], [0], [0], [1], [0, 0, 1, 1], [], []>} : vector<2x32xbf16>, vector<32x64xbf16>, vector<2x64xf32> -> vector<2x64xf32>
    %c0_101 = arith.constant 0 : index
    %c0_102 = arith.constant 0 : index
    %326 = vector.load %arg7[%c0_101, %c0_102] : memref<1x64xf32, #tpu.memory_space<vmem>>, vector<1x64xf32>
    %327 = vector.broadcast %326 : vector<1x64xf32> to vector<2x64xf32>
    %328 = arith.addf %325, %327 : vector<2x64xf32>
    %cst_103 = arith.constant 0.000000e+00 : f32
    %329 = vector.broadcast %cst_103 : f32 to vector<2x64xf32>
    %330 = arith.maximumf %328, %329 : vector<2x64xf32>
    %331 = arith.truncf %330 : vector<2x64xf32> to vector<2x64xbf16>
    %c0_104 = arith.constant 0 : index
    %c0_105 = arith.constant 0 : index
    %332 = vector.load %arg8[%c0_104, %c0_105] : memref<64x8xbf16, #tpu.memory_space<vmem>>, vector<64x8xbf16>
    %cst_106 = arith.constant dense<0.000000e+00> : vector<2x8xf32>
    %333 = tpu.matmul %331, %332, %cst_106 {dimension_numbers = #tpu.dot_dimension_numbers<[1], [0], [0], [1], [0, 0, 1, 1], [], []>} : vector<2x64xbf16>, vector<64x8xbf16>, vector<2x8xf32> -> vector<2x8xf32>
    %c0_107 = arith.constant 0 : index
    %c0_108 = arith.constant 0 : index
    %334 = vector.load %arg9[%c0_107, %c0_108] : memref<1x8xf32, #tpu.memory_space<vmem>>, vector<1x8xf32>
    %335 = vector.broadcast %334 : vector<1x8xf32> to vector<2x8xf32>
    %336 = arith.addf %333, %335 : vector<2x8xf32>
    %cst_109 = arith.constant dense<0xFF800000> : vector<2xf32>
    %337 = vector.multi_reduction <maximumf>, %336, %cst_109 [1] : vector<2x8xf32> to vector<2xf32>
    %338 = vector.shape_cast %337 : vector<2xf32> to vector<2x1xf32>
    %339 = vector.broadcast %338 : vector<2x1xf32> to vector<2x8xf32>
    %340 = arith.subf %336, %339 : vector<2x8xf32>
    %341 = math.exp %340 : vector<2x8xf32>
    %cst_110 = arith.constant dense<0.000000e+00> : vector<2xf32>
    %342 = vector.multi_reduction <add>, %341, %cst_110 [1] : vector<2x8xf32> to vector<2xf32>
    %343 = vector.shape_cast %342 : vector<2xf32> to vector<2x1xf32>
    %344 = vector.broadcast %343 : vector<2x1xf32> to vector<2x8xf32>
    %345 = arith.divf %341, %344 : vector<2x8xf32>
    %c0_111 = arith.constant 0 : index
    %c0_112 = arith.constant 0 : index
    %346 = vector.load %arg10[%c0_111, %c0_112] : memref<2x8xf32, #tpu.memory_space<vmem>>, vector<2x8xf32>
    tpu.vector_store %arg10[%c0_111, %c0_112], %345 {strides = array<i32>} : memref<2x8xf32, #tpu.memory_space<vmem>>, vector<2x8xf32>,
    return
  }
}

</mosaic_0001>

<bundles_post_ra>
// kernel: simple_sequence_lstm_forward.1
= control target key start
LH: loop header
LB: loop body
LE: loop exit
PB: predicated region body
PF: predicated region fallthrough
CT: control target
= control target key end

     0   :  { %v1950_v1 = vmov 0.0   ;;  %vm1951_vm0 = vmmov 0   ;;  %vm74_vm1 = vcmask 261120   ;;  %s2390_s0 = inlined_call_operand.vmem [shape: bf16[16,32], index: 0, kind: input, shape index: {}]   ;;  %s2391_s1 = inlined_call_operand.vmem [shape: f32[2,2,32], index: 1, kind: input, shape index: {}]   ;;  %s2392_s2 = inlined_call_operand.vmem [shape: f32[2,2,32], index: 2, kind: input, shape index: {}]   ;;  %s2393_s3 = inlined_call_operand.vmem [shape: bf16[2,32,128], index: 3, kind: input, shape index: {}]   ;;  %s2394_s4 = inlined_call_operand.vmem [shape: bf16[2,32,128], index: 4, kind: input, shape index: {}]   ;;  %s2395_s5 = inlined_call_operand.vmem [shape: f32[2,1,128], index: 5, kind: input, shape index: {}]   ;;  %s2396_s6 = inlined_call_operand.vmem [shape: bf16[32,64], index: 6, kind: input, shape index: {}]   ;;  %s2397_s7 = inlined_call_operand.vmem [shape: f32[1,64], index: 7, kind: input, shape index: {}]   ;;  %s2398_s8 = inlined_call_operand.vmem [shape: bf16[64,8], index: 8, kind: input, shape index: {}]   ;;  %s2399_s9 = inlined_call_operand.vmem [shape: f32[1,8], index: 9, kind: input, shape index: {}]   ;;  %s2400_s10 = inlined_call_operand.hbm [shape: f32[2,8], index: 10, kind: output, shape index: {}]  }
   0x1   :  { %v1845_v0 = vld [vmem:[%s2393_s3 + $0x8] sm:$0xff]   ;;  %1675 = vmatprep.subr.bf16.mxu0 %v1950_v1  ;;  %1683 = vmatprep.subr.bf16.mxu1 %v1950_v1  ;;  %v1846_v2 = vld [vmem:[%s2393_s3] sm:$0xff]  }
   0x2   :  { %1676 = vmatpush3.bf16.msra.mxu0 %v1845_v0  ;;  %v2022_v3 = vld [vmem:[%s2394_s4 + $0x8] sm:$0xff]   ;;  %1679 = vmatprep.mubr.msk.bf16.mxu0 %vm1951_vm0, %v1950_v1  ;;  %v2033_v4 = vld [vmem:[%s2394_s4] sm:$0xff]  }
   0x3   :  { %1677 = vmatprep.subr.bf16.mxu0 %v1950_v1  ;;  %1687 = vmatprep.mubr.msk.bf16.mxu1 %vm1951_vm0, %v1950_v1  ;;  %v1848_v5 = vld [vmem:[%s2390_s0] sm:$0xff]  }
   0x4   :  { %1684 = vmatpush3.bf16.msra.mxu1 %v2022_v3  ;;  %v125_v6 = vld [vmem:[%s2391_s1] sm:$0x3] }
   0x5   :  { %1685 = vmatprep.subr.bf16.mxu1 %v1950_v1  ;;  %v126_v7 = vpack.c.bf16 %v125_v6, %v125_v6 }
   0x6   :  { %1678 = vmatpush3.bf16.msra.mxu0 %v1846_v2 }
   0x7   :  { %1691 = vmatprep.subr.bf16.mxu0 %v1950_v1 }
   0x8   :  { %1686 = vmatpush3.bf16.msra.mxu1 %v2033_v4 }
   0x9   :  { %1680 = vmatmul.mubr.msk.bf16.vlgmr.msra.gmra.mxu0 %vm74_vm1, %v1848_v5  ;;  %1699 = vmatprep.subr.bf16.mxu1 %v1950_v1 }
   0xa   :  { %1692 = vmatpush3.bf16.msra.mxu0 %v2022_v3  ;;  %1695 = vmatprep.mubr.msk.bf16.mxu0 %vm1951_vm0, %v1950_v1 }
   0xb   :  { %1688 = vmatmul.mubr.msk.bf16.vlgmr.msra.gmra.mxu1 %vm74_vm1, %v126_v7  ;;  %1693 = vmatprep.subr.bf16.mxu0 %v1950_v1 }
   0xc   :  { %1700 = vmatpush3.bf16.msra.mxu1 %v2022_v3  ;;  %1703 = vmatprep.mubr.msk.bf16.mxu1 %vm1951_vm0, %v1950_v1 }
   0xd   :  { %15 = vsyncpa [#allocation6], 0  ;;  %1701 = vmatprep.subr.bf16.mxu1 %v1950_v1  ;;  %v37_v8 = vlaneseq  ;;  %v1563_v9 = vld [vmem:[%s2395_s5] ss:$0 sm:$0xff]  ;;  %v1952_v21 = vmov 0.5   ;;  %s1953_s26 = smov 64  }
   0xe   :  { %1694 = vmatpush3.bf16.msra.mxu0 %v2033_v4  ;;  %v127_v30 = vld [vmem:[%s2392_s2] sm:$0x3]  ;;  %s1954_s29 = smov 32   ;;  %vm214_vm5 = vcmask 254976   ;;  %vm1492_vm6 = vcmask 523264   ;;  %vm1536_vm7 = vcmask 58368  }
   0xf   :  { %1707 = vmatprep.subr.bf16.mxu0 %v1950_v1  ;;  %v38_v11 = vand.u32 127, %v37_v8 }
  0x10   :  { %1702 = vmatpush3.bf16.msra.mxu1 %v2033_v4 }
  0x11   :  { %1715 = vmatprep.subr.bf16.mxu1 %v1950_v1  ;;  %vm39_vm2 = vcmp.ge.s32.totalorder %v38_v11, 64  ;;  %vm40_vm3 = vcmp.lt.s32.totalorder %v38_v11, 96 }
  0x12   :  { %vm41_vm4 = vmand %vm39_vm2, %vm40_vm3 }
  0x13   :  { %v2062_v22 = vsel %vm41_vm4, 1.0, %v1952_v21  ;;  %v2065_v27 = vsel %vm41_vm4, 0.0, %v1952_v21 }
  0xc9   :  { %v112_v10 = vpop.f32.mrf.mxu0 }
  0xca   :  { %v113_v12 = vadd.f32 %v1563_v9, %v112_v10 }
  0xcb   :  { %v1681_v13 = vpop.f32.mrf.mxu0  ;;  %v178_v14 = vpop.f32.mrf.mxu1 }
  0xcc   :  { %119 = vst [vmem:[#allocation2] sm:$0xff] %v113_v12 }
  0xcd   :  { %v115_v15 = vpop.f32.mrf.mxu0  ;;  %v1689_v16 = vpop.f32.mrf.mxu1 }
  0xce   :  { %v116_v17 = vadd.f32 %v1563_v9, %v115_v15 }
  0xcf   :  { %v1682_v18 = vpop.f32.mrf.mxu0  ;;  %v181_v19 = vpop.f32.mrf.mxu1 }
  0xd0   :  { %120 = vst [vmem:[#allocation2 + $0x8] sm:$0xff] %v116_v17 }
  0xd1   :  { %v1690_v20 = vpop.f32.mrf.mxu1 }
  0xd3   :  { %v128_v23 = vld [vmem:[#allocation2] sm:$0x3]  ;;  %v216_v42 = vld [vmem:[#allocation2 + $0x2] sm:$0x3]  ;;  %v290_v62 = vld [vmem:[#allocation2 + $0x4] sm:$0x3] }
  0xd4   :  { %v179_v24 = vadd.f32 %v178_v14, %v128_v23  ;;  %v364_v21 = vld [vmem:[#allocation2 + $0x6] sm:$0x3] }
  0xd6   :  { %v184_v25 = vmul.f32 %v179_v24, %v2062_v22 }
  0xd8   :  { %1860 = vtanh.f32 %v184_v25 }
  0xe5   :  { %v1861_v26 = vpop.eup %1860 }
  0xe6   :  { %v186_v28 = vmul.f32 %v1861_v26, %v2062_v22 }
  0xe8   :  { %v187_v29 = vadd.f32 %v186_v28, %v2065_v27 }
  0xea   :  { %194 = vrot.lane.b32.xlu0 %v187_v29, %s1953_s26 }
  0xee   :  { %189 = vrot.lane.b32.xlu0 %v127_v30, %s1954_s29 }
 0x15c   :  { %v195_v31 = vpop.permute.xlu0 %194 }
 0x15d   :  { %v197_v32 = vmul.f32 %v195_v31, %v187_v29 }
 0x15f   :  { %199 = vrot.lane.b32.xlu1 %v197_v32, %s1954_s29 }
 0x160   :  { %v190_v33 = vpop.permute.xlu0 %189 }
 0x161   :  { %v192_v34 = vmul.f32 %v190_v33, %v187_v29 }
 0x1d1   :  { %v200_v35 = vpop.permute.xlu1 %199 }
 0x1d2   :  { %v202_v36 = vadd.f32 %v200_v35, %v192_v34 }
 0x1d4   :  { %1862 = vtanh.f32 %v202_v36 }
 0x1e1   :  { %v1863_v37 = vpop.eup %1862 }
 0x1e2   :  { %205 = vrot.lane.b32.xlu1 %v1863_v37, %s1953_s26 }
 0x254   :  { %v206_v38 = vpop.permute.xlu1 %205 }
 0x255   :  { %v2076_v39 = vmul.f32 %v206_v38, %v187_v29 }
 0x257   :  { %v209_v40 = vpack.c.bf16 %v2076_v39, %v2076_v39 }
 0x259   :  { %218 = vrot.lane.b32.xlu0 %v209_v40, %s1954_s29 }
 0x2cb   :  { %v219_v41 = vpop.permute.xlu0 %218 }
 0x2cc   :  { %1696 = vmatmul.mubr.msk.bf16.vlgmr.msra.gmra.mxu0 %vm74_vm1, %v219_v41 }
 0x2cd   :  { %1708 = vmatpush3.bf16.msra.mxu0 %v2022_v3  ;;  %1711 = vmatprep.mubr.msk.bf16.mxu0 %vm1951_vm0, %v1950_v1 }
 0x2ce   :  { %1709 = vmatprep.subr.bf16.mxu0 %v1950_v1 }
 0x2d1   :  { %1710 = vmatpush3.bf16.msra.mxu0 %v2033_v4 }
 0x2d2   :  { %1723 = vmatprep.subr.bf16.mxu0 %v1950_v1 }
 0x38c   :  { %v257_v43 = vpop.f32.mrf.mxu0 }
 0x38d   :  { %v258_v44 = vadd.f32 %v257_v43, %v216_v42 }
 0x38e   :  { %v1697_v45 = vpop.f32.mrf.mxu0 }
 0x38f   :  { %v263_v46 = vmul.f32 %v258_v44, %v2062_v22  ;;  %v438_v44 = vld [vmem:[#allocation2 + $0x8] sm:$0x3] }
 0x390   :  { %v260_v47 = vpop.f32.mrf.mxu0 }
 0x391   :  { %1864 = vtanh.f32 %v263_v46 }
 0x392   :  { %v1698_v48 = vpop.f32.mrf.mxu0 }
 0x39e   :  { %v1865_v49 = vpop.eup %1864 }
 0x39f   :  { %v265_v50 = vmul.f32 %v1865_v49, %v2062_v22 }
 0x3a1   :  { %v266_v51 = vadd.f32 %v265_v50, %v2065_v27 }
 0x3a3   :  { %269 = vrot.lane.b32.xlu1 %v266_v51, %s1953_s26  ;;  %v267_v54 = vmul.f32 %v266_v51, %v202_v36 }
 0x415   :  { %v270_v52 = vpop.permute.xlu1 %269 }
 0x416   :  { %v272_v53 = vmul.f32 %v270_v52, %v266_v51 }
 0x418   :  { %274 = vrot.lane.b32.xlu0 %v272_v53, %s1954_s29 }
 0x48a   :  { %v275_v55 = vpop.permute.xlu0 %274 }
 0x48b   :  { %v277_v56 = vadd.f32 %v275_v55, %v267_v54 }
 0x48d   :  { %1866 = vtanh.f32 %v277_v56 }
 0x49a   :  { %v1867_v57 = vpop.eup %1866 }
 0x49b   :  { %280 = vrot.lane.b32.xlu1 %v1867_v57, %s1953_s26 }
 0x50d   :  { %v281_v58 = vpop.permute.xlu1 %280 }
 0x50e   :  { %v2094_v59 = vmul.f32 %v281_v58, %v266_v51 }
 0x510   :  { %v284_v60 = vpack.c.bf16 %v2094_v59, %v2094_v59 }
 0x512   :  { %292 = vrot.lane.b32.xlu0 %v284_v60, %s1954_s29 }
 0x584   :  { %v293_v61 = vpop.permute.xlu0 %292 }
 0x585   :  { %1704 = vmatmul.mubr.msk.bf16.vlgmr.msra.gmra.mxu1 %vm74_vm1, %v293_v61 }
 0x586   :  { %1716 = vmatpush3.bf16.msra.mxu1 %v2022_v3  ;;  %1719 = vmatprep.mubr.msk.bf16.mxu1 %vm1951_vm0, %v1950_v1 }
 0x587   :  { %1717 = vmatprep.subr.bf16.mxu1 %v1950_v1 }
 0x58a   :  { %1718 = vmatpush3.bf16.msra.mxu1 %v2033_v4 }
 0x58b   :  { %1731 = vmatprep.subr.bf16.mxu1 %v1950_v1 }
 0x645   :  { %v331_v63 = vpop.f32.mrf.mxu1 }
 0x646   :  { %v332_v0 = vadd.f32 %v331_v63, %v290_v62 }
 0x647   :  { %v1705_v2 = vpop.f32.mrf.mxu1 }
 0x648   :  { %v337_v5 = vmul.f32 %v332_v0, %v2062_v22  ;;  %v512_v2 = vld [vmem:[#allocation2 + $0xa] sm:$0x3] }
 0x649   :  { %v334_v6 = vpop.f32.mrf.mxu1 }
 0x64a   :  { %1868 = vtanh.f32 %v337_v5 }
 0x64b   :  { %v1706_v7 = vpop.f32.mrf.mxu1 }
 0x657   :  { %v1869_v8 = vpop.eup %1868 }
 0x658   :  { %v339_v9 = vmul.f32 %v1869_v8, %v2062_v22 }
 0x65a   :  { %v340_v10 = vadd.f32 %v339_v9, %v2065_v27 }
 0x65c   :  { %343 = vrot.lane.b32.xlu1 %v340_v10, %s1953_s26  ;;  %v341_v13 = vmul.f32 %v340_v10, %v277_v56 }
 0x6ce   :  { %v344_v11 = vpop.permute.xlu1 %343 }
 0x6cf   :  { %v346_v12 = vmul.f32 %v344_v11, %v340_v10 }
 0x6d1   :  { %348 = vrot.lane.b32.xlu0 %v346_v12, %s1954_s29 }
 0x743   :  { %v349_v14 = vpop.permute.xlu0 %348 }
 0x744   :  { %v351_v15 = vadd.f32 %v349_v14, %v341_v13 }
 0x746   :  { %1870 = vtanh.f32 %v351_v15 }
 0x753   :  { %v1871_v16 = vpop.eup %1870 }
 0x754   :  { %354 = vrot.lane.b32.xlu1 %v1871_v16, %s1953_s26 }
 0x7c6   :  { %v355_v17 = vpop.permute.xlu1 %354 }
 0x7c7   :  { %v2112_v18 = vmul.f32 %v355_v17, %v340_v10 }
 0x7c9   :  { %v358_v19 = vpack.c.bf16 %v2112_v18, %v2112_v18 }
 0x7cb   :  { %366 = vrot.lane.b32.xlu0 %v358_v19, %s1954_s29 }
 0x83d   :  { %v367_v20 = vpop.permute.xlu0 %366 }
 0x83e   :  { %1712 = vmatmul.mubr.msk.bf16.vlgmr.msra.gmra.mxu0 %vm74_vm1, %v367_v20 }
 0x83f   :  { %1724 = vmatpush3.bf16.msra.mxu0 %v2022_v3  ;;  %1727 = vmatprep.mubr.msk.bf16.mxu0 %vm1951_vm0, %v1950_v1 }
 0x840   :  { %1725 = vmatprep.subr.bf16.mxu0 %v1950_v1 }
 0x843   :  { %1726 = vmatpush3.bf16.msra.mxu0 %v2033_v4 }
 0x844   :  { %1739 = vmatprep.subr.bf16.mxu0 %v1950_v1 }
 0x8fe   :  { %v405_v23 = vpop.f32.mrf.mxu0 }
 0x8ff   :  { %v406_v24 = vadd.f32 %v405_v23, %v364_v21 }
 0x900   :  { %v1713_v25 = vpop.f32.mrf.mxu0 }
 0x901   :  { %v411_v26 = vmul.f32 %v406_v24, %v2062_v22  ;;  %v586_v24 = vld [vmem:[#allocation2 + $0xc] sm:$0x3] }
 0x902   :  { %v408_v28 = vpop.f32.mrf.mxu0 }
 0x903   :  { %1872 = vtanh.f32 %v411_v26 }
 0x904   :  { %v1714_v29 = vpop.f32.mrf.mxu0 }
 0x910   :  { %v1873_v30 = vpop.eup %1872 }
 0x911   :  { %v413_v31 = vmul.f32 %v1873_v30, %v2062_v22 }
 0x913   :  { %v414_v32 = vadd.f32 %v413_v31, %v2065_v27 }
 0x915   :  { %417 = vrot.lane.b32.xlu1 %v414_v32, %s1953_s26  ;;  %v415_v35 = vmul.f32 %v414_v32, %v351_v15 }
 0x987   :  { %v418_v33 = vpop.permute.xlu1 %417 }
 0x988   :  { %v420_v34 = vmul.f32 %v418_v33, %v414_v32 }
 0x98a   :  { %422 = vrot.lane.b32.xlu0 %v420_v34, %s1954_s29 }
 0x9fc   :  { %v423_v36 = vpop.permute.xlu0 %422 }
 0x9fd   :  { %v425_v37 = vadd.f32 %v423_v36, %v415_v35 }
 0x9ff   :  { %1874 = vtanh.f32 %v425_v37 }
 0xa0c   :  { %v1875_v38 = vpop.eup %1874 }
 0xa0d   :  { %428 = vrot.lane.b32.xlu1 %v1875_v38, %s1953_s26 }
 0xa7f   :  { %v429_v40 = vpop.permute.xlu1 %428 }
 0xa80   :  { %v2130_v41 = vmul.f32 %v429_v40, %v414_v32 }
 0xa82   :  { %v432_v42 = vpack.c.bf16 %v2130_v41, %v2130_v41 }
 0xa84   :  { %440 = vrot.lane.b32.xlu0 %v432_v42, %s1954_s29 }
 0xaf6   :  { %v441_v43 = vpop.permute.xlu0 %440 }
 0xaf7   :  { %1720 = vmatmul.mubr.msk.bf16.vlgmr.msra.gmra.mxu1 %vm74_vm1, %v441_v43 }
 0xaf8   :  { %1732 = vmatpush3.bf16.msra.mxu1 %v2022_v3  ;;  %1735 = vmatprep.mubr.msk.bf16.mxu1 %vm1951_vm0, %v1950_v1 }
 0xaf9   :  { %1733 = vmatprep.subr.bf16.mxu1 %v1950_v1 }
 0xafc   :  { %1734 = vmatpush3.bf16.msra.mxu1 %v2033_v4 }
 0xafd   :  { %1747 = vmatprep.subr.bf16.mxu1 %v1950_v1 }
 0xbb7   :  { %v479_v45 = vpop.f32.mrf.mxu1 }
 0xbb8   :  { %v480_v46 = vadd.f32 %v479_v45, %v438_v44 }
 0xbb9   :  { %v1721_v47 = vpop.f32.mrf.mxu1 }
 0xbba   :  { %v485_v48 = vmul.f32 %v480_v46, %v2062_v22  ;;  %v660_v47 = vld [vmem:[#allocation2 + $0xe] sm:$0x3] }
 0xbbb   :  { %v482_v49 = vpop.f32.mrf.mxu1 }
 0xbbc   :  { %1876 = vtanh.f32 %v485_v48 }
 0xbbd   :  { %v1722_v50 = vpop.f32.mrf.mxu1 }
 0xbc9   :  { %v1877_v51 = vpop.eup %1876 }
 0xbca   :  { %v487_v52 = vmul.f32 %v1877_v51, %v2062_v22 }
 0xbcc   :  { %v488_v53 = vadd.f32 %v487_v52, %v2065_v27 }
 0xbce   :  { %491 = vrot.lane.b32.xlu1 %v488_v53, %s1953_s26  ;;  %v489_v56 = vmul.f32 %v488_v53, %v425_v37 }
 0xc40   :  { %v492_v54 = vpop.permute.xlu1 %491 }
 0xc41   :  { %v494_v55 = vmul.f32 %v492_v54, %v488_v53 }
 0xc43   :  { %496 = vrot.lane.b32.xlu0 %v494_v55, %s1954_s29 }
 0xcb5   :  { %v497_v57 = vpop.permute.xlu0 %496 }
 0xcb6   :  { %v499_v58 = vadd.f32 %v497_v57, %v489_v56 }
 0xcb8   :  { %1878 = vtanh.f32 %v499_v58 }
 0xcc5   :  { %v1879_v60 = vpop.eup %1878 }
 0xcc6   :  { %502 = vrot.lane.b32.xlu1 %v1879_v60, %s1953_s26 }
 0xd38   :  { %v503_v61 = vpop.permute.xlu1 %502 }
 0xd39   :  { %v2148_v62 = vmul.f32 %v503_v61, %v488_v53 }
 0xd3b   :  { %v506_v63 = vpack.c.bf16 %v2148_v62, %v2148_v62 }
 0xd3d   :  { %514 = vrot.lane.b32.xlu0 %v506_v63, %s1954_s29 }
 0xdaf   :  { %v515_v0 = vpop.permute.xlu0 %514 }
 0xdb0   :  { %1728 = vmatmul.mubr.msk.bf16.vlgmr.msra.gmra.mxu0 %vm74_vm1, %v515_v0 }
 0xdb1   :  { %1740 = vmatpush3.bf16.msra.mxu0 %v2022_v3  ;;  %1743 = vmatprep.mubr.msk.bf16.mxu0 %vm1951_vm0, %v1950_v1 }
 0xdb2   :  { %1741 = vmatprep.subr.bf16.mxu0 %v1950_v1 }
 0xdb5   :  { %1742 = vmatpush3.bf16.msra.mxu0 %v2033_v4 }
 0xdb6   :  { %1755 = vmatprep.subr.bf16.mxu0 %v1950_v1 }
 0xe70   :  { %v553_v5 = vpop.f32.mrf.mxu0 }
 0xe71   :  { %v554_v6 = vadd.f32 %v553_v5, %v512_v2 }
 0xe72   :  { %v1729_v7 = vpop.f32.mrf.mxu0 }
 0xe73   :  { %v559_v8 = vmul.f32 %v554_v6, %v2062_v22  ;;  %v2213_v6 = vld [vmem:[%s2394_s4 + $0x18] sm:$0xff]   ;;  %v2225_v7 = vld [vmem:[%s2394_s4 + $0x10] sm:$0xff]  }
 0xe74   :  { %v556_v9 = vpop.f32.mrf.mxu0 }
 0xe75   :  { %1880 = vtanh.f32 %v559_v8  ;;  %v1591_v8 = vld [vmem:[%s2391_s1 + $0x2] sm:$0x3] }
 0xe76   :  { %v1730_v10 = vpop.f32.mrf.mxu0 }
 0xe77   :  { %v814_v10 = vpack.c.bf16 %v1591_v8, %v1591_v8 }
 0xe82   :  { %v1881_v11 = vpop.eup %1880 }
 0xe83   :  { %v561_v3 = vmul.f32 %v1881_v11, %v2062_v22 }
 0xe85   :  { %v562_v12 = vadd.f32 %v561_v3, %v2065_v27  ;;  %v1592_v3 = vld [vmem:[%s2392_s2 + $0x2] sm:$0x3] }
 0xe87   :  { %565 = vrot.lane.b32.xlu1 %v562_v12, %s1953_s26  ;;  %v563_v14 = vmul.f32 %v562_v12, %v499_v58 }
 0xef9   :  { %v566_v13 = vpop.permute.xlu1 %565 }
 0xefa   :  { %v568_v4 = vmul.f32 %v566_v13, %v562_v12 }
 0xefc   :  { %570 = vrot.lane.b32.xlu0 %v568_v4, %s1954_s29 }
 0xf6e   :  { %v571_v15 = vpop.permute.xlu0 %570 }
 0xf6f   :  { %v573_v16 = vadd.f32 %v571_v15, %v563_v14 }
 0xf71   :  { %1882 = vtanh.f32 %v573_v16 }
 0xf7e   :  { %v1883_v17 = vpop.eup %1882 }
 0xf7f   :  { %576 = vrot.lane.b32.xlu1 %v1883_v17, %s1953_s26 }
 0xff1   :  { %v577_v19 = vpop.permute.xlu1 %576 }
 0xff2   :  { %v2166_v20 = vmul.f32 %v577_v19, %v562_v12 }
 0xff4   :  { %v580_v21 = vpack.c.bf16 %v2166_v20, %v2166_v20 }
 0xff6   :  { %588 = vrot.lane.b32.xlu0 %v580_v21, %s1954_s29 }
0x1068   :  { %v589_v23 = vpop.permute.xlu0 %588 }
0x1069   :  { %1736 = vmatmul.mubr.msk.bf16.vlgmr.msra.gmra.mxu1 %vm74_vm1, %v589_v23  ;;  %v1583_v23 = vld [vmem:[%s2395_s5 + $0x1] ss:$0 sm:$0xff] }
0x106a   :  { %1751 = vmatprep.mubr.msk.bf16.mxu1 %vm1951_vm0, %v1950_v1 }
0x1129   :  { %v627_v25 = vpop.f32.mrf.mxu1 }
0x112a   :  { %v628_v26 = vadd.f32 %v627_v25, %v586_v24 }
0x112b   :  { %v1737_v28 = vpop.f32.mrf.mxu1 }
0x112c   :  { %v633_v29 = vmul.f32 %v628_v26, %v2062_v22 }
0x112d   :  { %v630_v30 = vpop.f32.mrf.mxu1 }
0x112e   :  { %1884 = vtanh.f32 %v633_v29 }
0x112f   :  { %v1738_v31 = vpop.f32.mrf.mxu1 }
0x113b   :  { %v1885_v32 = vpop.eup %1884 }
0x113c   :  { %v635_v33 = vmul.f32 %v1885_v32, %v2062_v22 }
0x113e   :  { %v636_v34 = vadd.f32 %v635_v33, %v2065_v27 }
0x1140   :  { %639 = vrot.lane.b32.xlu1 %v636_v34, %s1953_s26  ;;  %v637_v37 = vmul.f32 %v636_v34, %v573_v16 }
0x11b2   :  { %v640_v35 = vpop.permute.xlu1 %639 }
0x11b3   :  { %v642_v36 = vmul.f32 %v640_v35, %v636_v34 }
0x11b5   :  { %644 = vrot.lane.b32.xlu0 %v642_v36, %s1954_s29 }
0x1227   :  { %v645_v38 = vpop.permute.xlu0 %644 }
0x1228   :  { %v647_v40 = vadd.f32 %v645_v38, %v637_v37 }
0x122a   :  { %1886 = vtanh.f32 %v647_v40 }
0x1237   :  { %v1887_v42 = vpop.eup %1886 }
0x1238   :  { %650 = vrot.lane.b32.xlu1 %v1887_v42, %s1953_s26 }
0x12aa   :  { %v651_v43 = vpop.permute.xlu1 %650 }
0x12ab   :  { %v653_v44 = vmul.f32 %v651_v43, %v636_v34 }
0x12ad   :  { %v654_v45 = vpack.c.bf16 %v653_v44, %v653_v44 }
0x12af   :  { %662 = vrot.lane.b32.xlu0 %v654_v45, %s1954_s29 }
0x1321   :  { %v663_v46 = vpop.permute.xlu0 %662 }
0x1322   :  { %1744 = vmatmul.mubr.msk.bf16.vlgmr.msra.gmra.mxu0 %vm74_vm1, %v663_v46 }
0x1323   :  { %1759 = vmatprep.mubr.msk.bf16.mxu0 %vm1951_vm0, %v1950_v1  ;;  %1756 = vmatpush3.bf16.msra.mxu0 %v2213_v6 }
0x1324   :  { %1757 = vmatprep.subr.bf16.mxu0 %v1950_v1 }
0x1327   :  { %1758 = vmatpush3.bf16.msra.mxu0 %v2225_v7 }
0x1328   :  { %1771 = vmatprep.subr.bf16.mxu0 %v1950_v1 }
0x132a   :  { %1760 = vmatmul.mubr.msk.bf16.vlgmr.msra.gmra.mxu0 %vm74_vm1, %v814_v10 }
0x132b   :  { %1772 = vmatpush3.bf16.msra.mxu0 %v2213_v6  ;;  %1775 = vmatprep.mubr.msk.bf16.mxu0 %vm1951_vm0, %v1950_v1 }
0x132c   :  { %1773 = vmatprep.subr.bf16.mxu0 %v1950_v1 }
0x132f   :  { %1774 = vmatpush3.bf16.msra.mxu0 %v2225_v7 }
0x1330   :  { %1787 = vmatprep.subr.bf16.mxu0 %v1950_v1 }
0x13e2   :  { %v701_v48 = vpop.f32.mrf.mxu0 }
0x13e3   :  { %v702_v49 = vadd.f32 %v701_v48, %v660_v47 }
0x13e4   :  { %v1745_v50 = vpop.f32.mrf.mxu0 }
0x13e5   :  { %v707_v51 = vmul.f32 %v702_v49, %v2062_v22 }
0x13e6   :  { %v704_v52 = vpop.f32.mrf.mxu0 }
0x13e7   :  { %1888 = vtanh.f32 %v707_v51 }
0x13e8   :  { %v1746_v53 = vpop.f32.mrf.mxu0 }
0x13ea   :  { %v867_v17 = vpop.f32.mrf.mxu0 }
0x13ec   :  { %v1761_v19 = vpop.f32.mrf.mxu0 }
0x13f4   :  { %v1889_v54 = vpop.eup %1888 }
0x13f5   :  { %v709_v55 = vmul.f32 %v1889_v54, %v2062_v22 }
0x13f7   :  { %v710_v56 = vadd.f32 %v709_v55, %v2065_v27 }
0x13f9   :  { %713 = vrot.lane.b32.xlu1 %v710_v56, %s1953_s26  ;;  %v711_v60 = vmul.f32 %v710_v56, %v647_v40 }
0x146b   :  { %v714_v57 = vpop.permute.xlu1 %713 }
0x146c   :  { %v716_v58 = vmul.f32 %v714_v57, %v710_v56 }
0x146e   :  { %718 = vrot.lane.b32.xlu0 %v716_v58, %s1954_s29 }
0x1472   :  { %211 = vrot.lane.b32.xlu0 %v2076_v39, %s1954_s29 }
0x1476   :  { %360 = vrot.lane.b32.xlu0 %v2112_v18, %s1954_s29 }
0x147a   :  { %508 = vrot.lane.b32.xlu0 %v2148_v62, %s1954_s29  ;;  %v1850_v62 = vld [vmem:[%s2393_s3 + $0x18] sm:$0xff]  }
0x147b   :  { %1748 = vmatpush3.bf16.msra.mxu1 %v1850_v62 }
0x147c   :  { %1749 = vmatprep.subr.bf16.mxu1 %v1950_v1 }
0x147e   :  { %656 = vrot.lane.b32.xlu0 %v653_v44, %s1954_s29 }
0x14e0   :  { %v719_v61 = vpop.permute.xlu0 %718 }
0x14e1   :  { %v721_v63 = vadd.f32 %v719_v61, %v711_v60 }
0x14e3   :  { %1890 = vtanh.f32 %v721_v63 }
0x14e4   :  { %v212_v0 = vpop.permute.xlu0 %211 }
0x14e5   :  { %215 = vst.msk [vmem:[#allocation4] sm:$0x3] %vm214_vm5, %v212_v0 }
0x14e8   :  { %v361_v2 = vpop.permute.xlu0 %360 }
0x14e9   :  { %363 = vst.msk [vmem:[#allocation4 + $0x4] sm:$0x3] %vm214_vm5, %v361_v2 }
0x14ec   :  { %v509_v39 = vpop.permute.xlu0 %508 }
0x14ed   :  { %511 = vst.msk [vmem:[#allocation4 + $0x8] sm:$0x3] %vm214_vm5, %v509_v39 }
0x14f0   :  { %v1891_v18 = vpop.eup %1890  ;;  %v657_v5 = vpop.permute.xlu0 %656 }
0x14f1   :  { %659 = vst.msk [vmem:[#allocation4 + $0xc] sm:$0x3] %vm214_vm5, %v657_v5  ;;  %724 = vrot.lane.b32.xlu1 %v1891_v18, %s1953_s26 }
0x14f5   :  { %286 = vrot.lane.b32.xlu1 %v2094_v59, %s1954_s29  ;;  %v1851_v59 = vld [vmem:[%s2393_s3 + $0x10] sm:$0xff]  }
0x14f6   :  { %1750 = vmatpush3.bf16.msra.mxu1 %v1851_v59 }
0x14f7   :  { %1763 = vmatprep.subr.bf16.mxu1 %v1950_v1 }
0x14f9   :  { %434 = vrot.lane.b32.xlu1 %v2130_v41, %s1954_s29 }
0x14fd   :  { %582 = vrot.lane.b32.xlu1 %v2166_v20, %s1954_s29  ;;  %v870_v20 = vpop.f32.mrf.mxu0 }
0x14ff   :  { %v1762_v21 = vpop.f32.mrf.mxu0 }
0x1563   :  { %v725_v41 = vpop.permute.xlu1 %724 }
0x1564   :  { %v727_v9 = vmul.f32 %v725_v41, %v710_v56 }
0x1566   :  { %729 = vrot.lane.b32.xlu1 %v727_v9, %s1954_s29 }
0x1567   :  { %v287_v11 = vpop.permute.xlu1 %286 }
0x1568   :  { %289 = vst.msk [vmem:[#allocation4 + $0x2] sm:$0x3] %vm214_vm5, %v287_v11 }
0x156a   :  { %878 = vrot.lane.b32.xlu1 %v1592_v3, %s1954_s29 }
0x156b   :  { %v435_v12 = vpop.permute.xlu1 %434 }
0x156c   :  { %437 = vst.msk [vmem:[#allocation4 + $0x6] sm:$0x3] %vm214_vm5, %v435_v12 }
0x156f   :  { %v583_v13 = vpop.permute.xlu1 %582 }
0x1570   :  { %585 = vst.msk [vmem:[#allocation4 + $0xa] sm:$0x3] %vm214_vm5, %v583_v13 }
0x1573   :  { %v733_v14 = vld [vmem:[#allocation4] sm:$0xff] }
0x15d8   :  { %v730_v4 = vpop.permute.xlu1 %729 }
0x15d9   :  { %732 = vst.msk [vmem:[#allocation4 + $0xe] sm:$0x3] %vm214_vm5, %v730_v4 }
0x15dc   :  { %v879_v40 = vpop.permute.xlu1 %878 }
0x15e0   :  { %v734_v15 = vld [vmem:[#allocation4 + $0x8] sm:$0xff] }
0x15e1   :  { %v735_v16 = vpack.c.bf16 %v734_v15, %v733_v14 }
0x15e3   :  { %1752 = vmatmul.mubr.msk.bf16.vlgmr.msra.gmra.mxu1 %vm74_vm1, %v735_v16 }
0x15e4   :  { %1764 = vmatpush3.bf16.msra.mxu1 %v2213_v6  ;;  %1767 = vmatprep.mubr.msk.bf16.mxu1 %vm1951_vm0, %v1950_v1 }
0x15e5   :  { %1765 = vmatprep.subr.bf16.mxu1 %v1950_v1 }
0x15e8   :  { %1766 = vmatpush3.bf16.msra.mxu1 %v2225_v7 }
0x15e9   :  { %1779 = vmatprep.subr.bf16.mxu1 %v1950_v1 }
0x16a3   :  { %v798_v24 = vpop.f32.mrf.mxu1 }
0x16a4   :  { %v799_v25 = vadd.f32 %v1583_v23, %v798_v24 }
0x16a5   :  { %v1753_v26 = vpop.f32.mrf.mxu1 }
0x16a6   :  { %805 = vst [vmem:[#allocation3] sm:$0xff] %v799_v25 }
0x16a7   :  { %v801_v28 = vpop.f32.mrf.mxu1 }
0x16a8   :  { %v802_v29 = vadd.f32 %v1583_v23, %v801_v28 }
0x16a9   :  { %v1754_v30 = vpop.f32.mrf.mxu1 }
0x16aa   :  { %806 = vst [vmem:[#allocation3 + $0x8] sm:$0xff] %v802_v29 }
0x16ad   :  { %v817_v31 = vld [vmem:[#allocation3] sm:$0x3]  ;;  %v899_v50 = vld [vmem:[#allocation3 + $0x2] sm:$0x3]  ;;  %v968_v8 = vld [vmem:[#allocation3 + $0x4] sm:$0x3] }
0x16ae   :  { %v868_v32 = vadd.f32 %v867_v17, %v817_v31  ;;  %v1037_v29 = vld [vmem:[#allocation3 + $0x6] sm:$0x3] }
0x16b0   :  { %v873_v33 = vmul.f32 %v868_v32, %v2062_v22 }
0x16b2   :  { %1892 = vtanh.f32 %v873_v33 }
0x16bf   :  { %v1893_v34 = vpop.eup %1892 }
0x16c0   :  { %v875_v35 = vmul.f32 %v1893_v34, %v2062_v22 }
0x16c2   :  { %v876_v36 = vadd.f32 %v875_v35, %v2065_v27 }
0x16c4   :  { %883 = vrot.lane.b32.xlu0 %v876_v36, %s1953_s26  ;;  %v881_v42 = vmul.f32 %v879_v40, %v876_v36 }
0x1736   :  { %v884_v37 = vpop.permute.xlu0 %883 }
0x1737   :  { %v886_v38 = vmul.f32 %v884_v37, %v876_v36 }
0x1739   :  { %888 = vrot.lane.b32.xlu0 %v886_v38, %s1954_s29 }
0x17ab   :  { %v889_v43 = vpop.permute.xlu0 %888 }
0x17ac   :  { %v891_v44 = vadd.f32 %v889_v43, %v881_v42 }
0x17ae   :  { %1894 = vtanh.f32 %v891_v44 }
0x17bb   :  { %v1895_v45 = vpop.eup %1894 }
0x17bc   :  { %894 = vrot.lane.b32.xlu1 %v1895_v45, %s1953_s26 }
0x182e   :  { %v895_v46 = vpop.permute.xlu1 %894 }
0x182f   :  { %v897_v47 = vmul.f32 %v895_v46, %v876_v36 }
0x1831   :  { %v898_v48 = vpack.c.bf16 %v897_v47, %v897_v47 }
0x1833   :  { %901 = vrot.lane.b32.xlu0 %v898_v48, %s1954_s29 }
0x18a5   :  { %v902_v49 = vpop.permute.xlu0 %901 }
0x18a6   :  { %1768 = vmatmul.mubr.msk.bf16.vlgmr.msra.gmra.mxu1 %vm74_vm1, %v902_v49 }
0x18a7   :  { %1780 = vmatpush3.bf16.msra.mxu1 %v2213_v6  ;;  %1783 = vmatprep.mubr.msk.bf16.mxu1 %vm1951_vm0, %v1950_v1 }
0x18a8   :  { %1781 = vmatprep.subr.bf16.mxu1 %v1950_v1 }
0x18ab   :  { %1782 = vmatpush3.bf16.msra.mxu1 %v2225_v7 }
0x18ac   :  { %1795 = vmatprep.subr.bf16.mxu1 %v1950_v1 }
0x1966   :  { %v940_v51 = vpop.f32.mrf.mxu1 }
0x1967   :  { %v941_v52 = vadd.f32 %v940_v51, %v899_v50  ;;  %v1106_v51 = vld [vmem:[#allocation3 + $0x8] sm:$0x3] }
0x1968   :  { %v1769_v53 = vpop.f32.mrf.mxu1 }
0x1969   :  { %v946_v54 = vmul.f32 %v941_v52, %v2062_v22 }
0x196a   :  { %v943_v55 = vpop.f32.mrf.mxu1 }
0x196b   :  { %1896 = vtanh.f32 %v946_v54 }
0x196c   :  { %v1770_v56 = vpop.f32.mrf.mxu1 }
0x1978   :  { %v1897_v57 = vpop.eup %1896 }
0x1979   :  { %v948_v58 = vmul.f32 %v1897_v57, %v2062_v22 }
0x197b   :  { %v949_v60 = vadd.f32 %v948_v58, %v2065_v27 }
0x197d   :  { %952 = vrot.lane.b32.xlu1 %v949_v60, %s1953_s26  ;;  %v950_v0 = vmul.f32 %v949_v60, %v891_v44 }
0x19ef   :  { %v953_v61 = vpop.permute.xlu1 %952 }
0x19f0   :  { %v955_v63 = vmul.f32 %v953_v61, %v949_v60 }
0x19f2   :  { %957 = vrot.lane.b32.xlu0 %v955_v63, %s1954_s29 }
0x1a64   :  { %v958_v2 = vpop.permute.xlu0 %957 }
0x1a65   :  { %v960_v39 = vadd.f32 %v958_v2, %v950_v0 }
0x1a67   :  { %1898 = vtanh.f32 %v960_v39 }
0x1a74   :  { %v1899_v18 = vpop.eup %1898 }
0x1a75   :  { %963 = vrot.lane.b32.xlu1 %v1899_v18, %s1953_s26 }
0x1ae7   :  { %v964_v5 = vpop.permute.xlu1 %963 }
0x1ae8   :  { %v966_v62 = vmul.f32 %v964_v5, %v949_v60 }
0x1aea   :  { %v967_v59 = vpack.c.bf16 %v966_v62, %v966_v62 }
0x1aec   :  { %970 = vrot.lane.b32.xlu0 %v967_v59, %s1954_s29 }
0x1b5e   :  { %v971_v41 = vpop.permute.xlu0 %970 }
0x1b5f   :  { %1776 = vmatmul.mubr.msk.bf16.vlgmr.msra.gmra.mxu0 %vm74_vm1, %v971_v41 }
0x1b60   :  { %1788 = vmatpush3.bf16.msra.mxu0 %v2213_v6  ;;  %1791 = vmatprep.mubr.msk.bf16.mxu0 %vm1951_vm0, %v1950_v1 }
0x1b61   :  { %1789 = vmatprep.subr.bf16.mxu0 %v1950_v1 }
0x1b64   :  { %1790 = vmatpush3.bf16.msra.mxu0 %v2225_v7 }
0x1b65   :  { %1803 = vmatprep.subr.bf16.mxu0 %v1950_v1 }
0x1c1f   :  { %v1009_v9 = vpop.f32.mrf.mxu0 }
0x1c20   :  { %v1010_v10 = vadd.f32 %v1009_v9, %v968_v8  ;;  %v1175_v9 = vld [vmem:[#allocation3 + $0xa] sm:$0x3] }
0x1c21   :  { %v1777_v11 = vpop.f32.mrf.mxu0 }
0x1c22   :  { %v1015_v3 = vmul.f32 %v1010_v10, %v2062_v22 }
0x1c23   :  { %v1012_v12 = vpop.f32.mrf.mxu0 }
0x1c24   :  { %1900 = vtanh.f32 %v1015_v3 }
0x1c25   :  { %v1778_v13 = vpop.f32.mrf.mxu0 }
0x1c31   :  { %v1901_v4 = vpop.eup %1900 }
0x1c32   :  { %v1017_v14 = vmul.f32 %v1901_v4, %v2062_v22 }
0x1c34   :  { %v1018_v15 = vadd.f32 %v1017_v14, %v2065_v27 }
0x1c36   :  { %1021 = vrot.lane.b32.xlu1 %v1018_v15, %s1953_s26  ;;  %v1019_v19 = vmul.f32 %v1018_v15, %v960_v39 }
0x1ca8   :  { %v1022_v16 = vpop.permute.xlu1 %1021 }
0x1ca9   :  { %v1024_v17 = vmul.f32 %v1022_v16, %v1018_v15 }
0x1cab   :  { %1026 = vrot.lane.b32.xlu0 %v1024_v17, %s1954_s29 }
0x1d1d   :  { %v1027_v20 = vpop.permute.xlu0 %1026 }
0x1d1e   :  { %v1029_v21 = vadd.f32 %v1027_v20, %v1019_v19 }
0x1d20   :  { %1902 = vtanh.f32 %v1029_v21 }
0x1d2d   :  { %v1903_v23 = vpop.eup %1902 }
0x1d2e   :  { %1032 = vrot.lane.b32.xlu1 %v1903_v23, %s1953_s26 }
0x1da0   :  { %v1033_v24 = vpop.permute.xlu1 %1032 }
0x1da1   :  { %v1035_v25 = vmul.f32 %v1033_v24, %v1018_v15 }
0x1da3   :  { %v1036_v26 = vpack.c.bf16 %v1035_v25, %v1035_v25 }
0x1da5   :  { %1039 = vrot.lane.b32.xlu0 %v1036_v26, %s1954_s29 }
0x1e17   :  { %v1040_v28 = vpop.permute.xlu0 %1039 }
0x1e18   :  { %1784 = vmatmul.mubr.msk.bf16.vlgmr.msra.gmra.mxu1 %vm74_vm1, %v1040_v28  ;;  %v1244_v28 = vld [vmem:[#allocation3 + $0xc] sm:$0x3] }
0x1e19   :  { %1796 = vmatpush3.bf16.msra.mxu1 %v2213_v6  ;;  %1799 = vmatprep.mubr.msk.bf16.mxu1 %vm1951_vm0, %v1950_v1 }
0x1e1a   :  { %1797 = vmatprep.subr.bf16.mxu1 %v1950_v1 }
0x1e1d   :  { %1798 = vmatpush3.bf16.msra.mxu1 %v2225_v7 }
0x1e1e   :  { %1811 = vmatprep.subr.bf16.mxu1 %v1950_v1 }
0x1ed8   :  { %v1078_v30 = vpop.f32.mrf.mxu1 }
0x1ed9   :  { %v1079_v31 = vadd.f32 %v1078_v30, %v1037_v29 }
0x1eda   :  { %v1785_v32 = vpop.f32.mrf.mxu1 }
0x1edb   :  { %v1084_v33 = vmul.f32 %v1079_v31, %v2062_v22 }
0x1edc   :  { %v1081_v34 = vpop.f32.mrf.mxu1 }
0x1edd   :  { %1904 = vtanh.f32 %v1084_v33 }
0x1ede   :  { %v1786_v35 = vpop.f32.mrf.mxu1 }
0x1eea   :  { %v1905_v36 = vpop.eup %1904 }
0x1eeb   :  { %v1086_v37 = vmul.f32 %v1905_v36, %v2062_v22 }
0x1eed   :  { %v1087_v38 = vadd.f32 %v1086_v37, %v2065_v27 }
0x1eef   :  { %1090 = vrot.lane.b32.xlu1 %v1087_v38, %s1953_s26  ;;  %v1088_v43 = vmul.f32 %v1087_v38, %v1029_v21 }
0x1f61   :  { %v1091_v40 = vpop.permute.xlu1 %1090 }
0x1f62   :  { %v1093_v42 = vmul.f32 %v1091_v40, %v1087_v38 }
0x1f64   :  { %1095 = vrot.lane.b32.xlu0 %v1093_v42, %s1954_s29 }
0x1fd6   :  { %v1096_v44 = vpop.permute.xlu0 %1095 }
0x1fd7   :  { %v1098_v45 = vadd.f32 %v1096_v44, %v1088_v43 }
0x1fd9   :  { %1906 = vtanh.f32 %v1098_v45 }
0x1fe6   :  { %v1907_v46 = vpop.eup %1906 }
0x1fe7   :  { %1101 = vrot.lane.b32.xlu1 %v1907_v46, %s1953_s26 }
0x2059   :  { %v1102_v47 = vpop.permute.xlu1 %1101 }
0x205a   :  { %v1104_v48 = vmul.f32 %v1102_v47, %v1087_v38 }
0x205c   :  { %v1105_v49 = vpack.c.bf16 %v1104_v48, %v1104_v48 }
0x205e   :  { %1108 = vrot.lane.b32.xlu0 %v1105_v49, %s1954_s29 }
0x20d0   :  { %v1109_v50 = vpop.permute.xlu0 %1108 }
0x20d1   :  { %1792 = vmatmul.mubr.msk.bf16.vlgmr.msra.gmra.mxu0 %vm74_vm1, %v1109_v50  ;;  %v1313_v50 = vld [vmem:[#allocation3 + $0xe] sm:$0x3] }
0x20d2   :  { %1804 = vmatpush3.bf16.msra.mxu0 %v2213_v6  ;;  %1807 = vmatprep.mubr.msk.bf16.mxu0 %vm1951_vm0, %v1950_v1 }
0x20d3   :  { %1805 = vmatprep.subr.bf16.mxu0 %v1950_v1 }
0x20d6   :  { %1806 = vmatpush3.bf16.msra.mxu0 %v2225_v7 }
0x20d7   :  { %1819 = vmatprep.subr.bf16.mxu0 %v1950_v1 }
0x2191   :  { %v1147_v52 = vpop.f32.mrf.mxu0 }
0x2192   :  { %v1148_v53 = vadd.f32 %v1147_v52, %v1106_v51 }
0x2193   :  { %v1793_v54 = vpop.f32.mrf.mxu0 }
0x2194   :  { %v1153_v55 = vmul.f32 %v1148_v53, %v2062_v22 }
0x2195   :  { %v1150_v56 = vpop.f32.mrf.mxu0 }
0x2196   :  { %1908 = vtanh.f32 %v1153_v55 }
0x2197   :  { %v1794_v57 = vpop.f32.mrf.mxu0 }
0x21a3   :  { %v1909_v58 = vpop.eup %1908 }
0x21a4   :  { %v1155_v60 = vmul.f32 %v1909_v58, %v2062_v22 }
0x21a6   :  { %v1156_v61 = vadd.f32 %v1155_v60, %v2065_v27 }
0x21a8   :  { %1159 = vrot.lane.b32.xlu1 %v1156_v61, %s1953_s26  ;;  %v1157_v2 = vmul.f32 %v1156_v61, %v1098_v45 }
0x221a   :  { %v1160_v63 = vpop.permute.xlu1 %1159 }
0x221b   :  { %v1162_v0 = vmul.f32 %v1160_v63, %v1156_v61 }
0x221d   :  { %1164 = vrot.lane.b32.xlu0 %v1162_v0, %s1954_s29 }
0x228f   :  { %v1165_v39 = vpop.permute.xlu0 %1164 }
0x2290   :  { %v1167_v18 = vadd.f32 %v1165_v39, %v1157_v2 }
0x2292   :  { %1910 = vtanh.f32 %v1167_v18 }
0x229f   :  { %v1911_v5 = vpop.eup %1910 }
0x22a0   :  { %1170 = vrot.lane.b32.xlu1 %v1911_v5, %s1953_s26  ;;  %v1856_v5 = vld [vmem:[%s2398_s8 + $0x18] sm:$0xff]  }
0x2312   :  { %v1171_v62 = vpop.permute.xlu1 %1170 }
0x2313   :  { %v1173_v59 = vmul.f32 %v1171_v62, %v1156_v61  ;;  %v1857_v62 = vld [vmem:[%s2398_s8 + $0x10] sm:$0xff]  }
0x2315   :  { %v1174_v41 = vpack.c.bf16 %v1173_v59, %v1173_v59 }
0x2317   :  { %1177 = vrot.lane.b32.xlu0 %v1174_v41, %s1954_s29 }
0x2389   :  { %v1178_v8 = vpop.permute.xlu0 %1177 }
0x238a   :  { %1800 = vmatmul.mubr.msk.bf16.vlgmr.msra.gmra.mxu1 %vm74_vm1, %v1178_v8 }
0x238b   :  { %1812 = vmatpush3.bf16.msra.mxu1 %v2213_v6  ;;  %1815 = vmatprep.mubr.msk.bf16.mxu1 %vm1951_vm0, %v1950_v1 }
0x238c   :  { %1813 = vmatprep.subr.bf16.mxu1 %v1950_v1 }
0x238f   :  { %1814 = vmatpush3.bf16.msra.mxu1 %v2225_v7 }
0x2390   :  { %1827 = vmatprep.subr.bf16.mxu1 %v1950_v1 }
0x244a   :  { %v1216_v10 = vpop.f32.mrf.mxu1 }
0x244b   :  { %v1217_v11 = vadd.f32 %v1216_v10, %v1175_v9  ;;  %v1858_v10 = vld [vmem:[%s2398_s8 + $0x8] sm:$0xff]  }
0x244c   :  { %v1801_v3 = vpop.f32.mrf.mxu1 }
0x244d   :  { %v1222_v12 = vmul.f32 %v1217_v11, %v2062_v22  ;;  %v1859_v11 = vld [vmem:[%s2398_s8] sm:$0xff]  }
0x244e   :  { %v1219_v13 = vpop.f32.mrf.mxu1  ;;  %v1603_v3 = vld [vmem:[%s2397_s7] ss:$0 sm:$0xff]  ;;  %s1955_s7 = smov [#allocation5]  }
0x244f   :  { %1912 = vtanh.f32 %v1222_v12  ;;  %s1555_s8 = sshll.u32 %s1955_s7, 4  ;;  %s1556_s8 = int_to_ptr.vmem [resolvable:$true] %s1555_s8 }
0x2450   :  { %v1802_v4 = vpop.f32.mrf.mxu1  ;;  %p1933_p1 = scmp.lt.s32.totalorder %s1556_s8, %s1556_s8 }
0x245c   :  { %v1913_v14 = vpop.eup %1912 }
0x245d   :  { %v1224_v6 = vmul.f32 %v1913_v14, %v2062_v22 }
0x245f   :  { %v1225_v15 = vadd.f32 %v1224_v6, %v2065_v27 }
0x2461   :  { %1228 = vrot.lane.b32.xlu1 %v1225_v15, %s1953_s26  ;;  %v1226_v17 = vmul.f32 %v1225_v15, %v1167_v18  ;;  %v1854_v18 = vld [vmem:[%s2396_s6 + $0x8] sm:$0xff]  }
0x24d3   :  { %v1229_v16 = vpop.permute.xlu1 %1228 }
0x24d4   :  { %v1231_v7 = vmul.f32 %v1229_v16, %v1225_v15 }
0x24d6   :  { %1233 = vrot.lane.b32.xlu0 %v1231_v7, %s1954_s29 }
0x2548   :  { %v1234_v19 = vpop.permute.xlu0 %1233 }
0x2549   :  { %v1236_v20 = vadd.f32 %v1234_v19, %v1226_v17 }
0x254b   :  { %1914 = vtanh.f32 %v1236_v20 }
0x2558   :  { %v1915_v21 = vpop.eup %1914 }
0x2559   :  { %1239 = vrot.lane.b32.xlu1 %v1915_v21, %s1953_s26 }
0x25cb   :  { %v1240_v23 = vpop.permute.xlu1 %1239 }
0x25cc   :  { %v1242_v24 = vmul.f32 %v1240_v23, %v1225_v15 }
0x25ce   :  { %v1243_v25 = vpack.c.bf16 %v1242_v24, %v1242_v24 }
0x25d0   :  { %1246 = vrot.lane.b32.xlu0 %v1243_v25, %s1954_s29 }
0x2642   :  { %v1247_v26 = vpop.permute.xlu0 %1246 }
0x2643   :  { %1808 = vmatmul.mubr.msk.bf16.vlgmr.msra.gmra.mxu0 %vm74_vm1, %v1247_v26 }
0x2644   :  { %1823 = vmatprep.mubr.msk.bf16.mxu0 %vm1951_vm0, %v1950_v1  ;;  %1820 = vmatpush3.bf16.msra.mxu0 %v1854_v18 }
0x2645   :  { %1821 = vmatprep.subr.bf16.mxu0 %v1950_v1 }
0x2703   :  { %v1285_v29 = vpop.f32.mrf.mxu0 }
0x2704   :  { %v1286_v30 = vadd.f32 %v1285_v29, %v1244_v28 }
0x2705   :  { %v1809_v31 = vpop.f32.mrf.mxu0 }
0x2706   :  { %v1291_v32 = vmul.f32 %v1286_v30, %v2062_v22 }
0x2707   :  { %v1288_v33 = vpop.f32.mrf.mxu0 }
0x2708   :  { %1916 = vtanh.f32 %v1291_v32 }
0x2709   :  { %v1810_v34 = vpop.f32.mrf.mxu0 }
0x2715   :  { %v1917_v35 = vpop.eup %1916 }
0x2716   :  { %v1293_v36 = vmul.f32 %v1917_v35, %v2062_v22 }
0x2718   :  { %v1294_v37 = vadd.f32 %v1293_v36, %v2065_v27 }
0x271a   :  { %1297 = vrot.lane.b32.xlu1 %v1294_v37, %s1953_s26  ;;  %v1295_v42 = vmul.f32 %v1294_v37, %v1236_v20 }
0x278c   :  { %v1298_v38 = vpop.permute.xlu1 %1297 }
0x278d   :  { %v1300_v40 = vmul.f32 %v1298_v38, %v1294_v37 }
0x278f   :  { %1302 = vrot.lane.b32.xlu0 %v1300_v40, %s1954_s29 }
0x2801   :  { %v1303_v43 = vpop.permute.xlu0 %1302 }
0x2802   :  { %v1305_v44 = vadd.f32 %v1303_v43, %v1295_v42 }
0x2804   :  { %1918 = vtanh.f32 %v1305_v44 }
0x2811   :  { %v1919_v45 = vpop.eup %1918 }
0x2812   :  { %1308 = vrot.lane.b32.xlu1 %v1919_v45, %s1953_s26 }
0x2884   :  { %v1309_v46 = vpop.permute.xlu1 %1308 }
0x2885   :  { %v1311_v47 = vmul.f32 %v1309_v46, %v1294_v37 }
0x2887   :  { %v1312_v48 = vpack.c.bf16 %v1311_v47, %v1311_v47 }
0x2889   :  { %1315 = vrot.lane.b32.xlu0 %v1312_v48, %s1954_s29 }
0x28fb   :  { %v1316_v49 = vpop.permute.xlu0 %1315 }
0x28fc   :  { %1816 = vmatmul.mubr.msk.bf16.vlgmr.msra.gmra.mxu1 %vm74_vm1, %v1316_v49 }
0x28fd   :  { %1835 = vmatprep.mubr.msk.bf16.mxu1 %vm1951_vm0, %v1950_v1  ;;  %1828 = vmatpush3.bf16.msra.mxu1 %v1856_v5 }
0x28fe   :  { %1829 = vmatprep.subr.bf16.mxu1 %v1950_v1 }
0x2901   :  { %1830 = vmatpush3.bf16.msra.mxu1 %v1857_v62 }
0x2902   :  { %1831 = vmatprep.subr.bf16.mxu1 %v1950_v1 }
0x2905   :  { %1832 = vmatpush3.bf16.msra.mxu1 %v1858_v10 }
0x2906   :  { %1833 = vmatprep.subr.bf16.mxu1 %v1950_v1  ;;  %v1607_v1 = vld [vmem:[%s2399_s9] ss:$0 sm:$0xff]  ;;  %s1928_s9 = scalar_lea.vmem %s1556_s8, 32 }
0x2907   :  { %p1929_p0 = scmp.ne.s32.totalorder %s1556_s8, %s1928_s9  ;;  %p1934_p2 = scmp.lt.s32.totalorder %s1928_s9, %s1928_s9 }
0x2909   :  { %1834 = vmatpush3.bf16.msra.mxu1 %v1859_v11  ;;  %p1935_p3 = por %p1934_p2, %p1933_p1 }
0x290b   :  { %p1936_p4 = pnand %p1935_p3, %p1929_p0 }
0x29bc   :  { %v1354_v51 = vpop.f32.mrf.mxu1 }
0x29bd   :  { %v1355_v52 = vadd.f32 %v1354_v51, %v1313_v50 }
0x29be   :  { %v1817_v53 = vpop.f32.mrf.mxu1 }
0x29bf   :  { %v1360_v54 = vmul.f32 %v1355_v52, %v2062_v22 }
0x29c0   :  { %v1357_v55 = vpop.f32.mrf.mxu1 }
0x29c1   :  { %1920 = vtanh.f32 %v1360_v54 }
0x29c2   :  { %v1818_v56 = vpop.f32.mrf.mxu1 }
0x29ce   :  { %v1921_v57 = vpop.eup %1920 }
0x29cf   :  { %v1362_v58 = vmul.f32 %v1921_v57, %v2062_v22  ;;  %v1855_v22 = vld [vmem:[%s2396_s6] sm:$0xff]  }
0x29d0   :  { %1822 = vmatpush3.bf16.msra.mxu0 %v1855_v22 }
0x29d1   :  { %v1363_v60 = vadd.f32 %v1362_v58, %v2065_v27 }
0x29d3   :  { %1366 = vrot.lane.b32.xlu1 %v1363_v60, %s1953_s26  ;;  %v1364_v0 = vmul.f32 %v1363_v60, %v1305_v44 }
0x2a45   :  { %v1367_v61 = vpop.permute.xlu1 %1366 }
0x2a46   :  { %v1369_v63 = vmul.f32 %v1367_v61, %v1363_v60 }
0x2a48   :  { %1371 = vrot.lane.b32.xlu0 %v1369_v63, %s1954_s29 }
0x2aba   :  { %v1372_v2 = vpop.permute.xlu0 %1371 }
0x2abb   :  { %v1374_v39 = vadd.f32 %v1372_v2, %v1364_v0 }
0x2abd   :  { %1922 = vtanh.f32 %v1374_v39 }
0x2aca   :  { %v1923_v27 = vpop.eup %1922 }
0x2acb   :  { %1377 = vrot.lane.b32.xlu1 %v1923_v27, %s1953_s26 }
0x2b3d   :  { %v1378_v59 = vpop.permute.xlu1 %1377 }
0x2b3e   :  { %v1380_v41 = vmul.f32 %v1378_v59, %v1363_v60 }
0x2b40   :  { %v1381_v8 = vpack.c.bf16 %v1380_v41, %v1380_v41 }
0x2b42   :  { %1394 = vrot.lane.b32.xlu0 %v1381_v8, %s1954_s29 }
0x2bb4   :  { %v1395_v9 = vpop.permute.xlu0 %1394 }
0x2bb5   :  { %1824 = vmatmul.mubr.msk.bf16.vlgmr.msra.gmra.mxu0 %vm74_vm1, %v1395_v9 }
0x2c75   :  { %v1445_v12 = vpop.f32.mrf.mxu0 }
0x2c76   :  { %v1446_v13 = vadd.f32 %v1603_v3, %v1445_v12 }
0x2c77   :  { %v1825_v4 = vpop.f32.mrf.mxu0 }
0x2c78   :  { %v1451_v14 = vmax.f32 %v1446_v13, 0.0 }
0x2c79   :  { %v1448_v6 = vpop.f32.mrf.mxu0 }
0x2c7a   :  { %v1452_v15 = vpack.c.bf16 %v1451_v14, %v1451_v14 }
0x2c7b   :  { %v1826_v16 = vpop.f32.mrf.mxu0 }
0x2c7c   :  { %1836 = vmatmul.mubr.msk.bf16.vlgmr.msra.gmra.mxu1 %vm1492_vm6, %v1452_v15 }
0x2d3c   :  { %v1530_v7 = vpop.f32.mrf.mxu1 }
0x2d3d   :  { %v1531_v17 = vadd.f32 %v1607_v1, %v1530_v7 }
0x2d3e   :  { %v1837_v19 = vpop.f32.mrf.mxu1 }
0x2d3f   :  { %v1537_v20 = vsel %vm1536_vm7, %v1531_v17, -inf }
0x2d40   :  { %1538 = vmax.xlane.f32.xlu1 %v1537_v20  ;;  %v1533_v21 = vpop.f32.mrf.mxu1 }
0x2d42   :  { %v1838_v23 = vpop.f32.mrf.mxu1 }
0x2dc9   :  { %v1539_v24 = vpop.xlane.xlu1 %1538 }
0x2dca   :  { %v1540_v25 = vsub.f32 %v1531_v17, %v1539_v24 }
0x2dcc   :  { %v1541_v26 = vmul.f32 1.442695, %v1540_v25 }
0x2dce   :  { %1924 = vpow2.f32 %v1541_v26 }
0x2ddb   :  { %v1925_v28 = vpop.eup %1924 }
0x2ddc   :  { %v1543_v29 = vsel %vm1536_vm7, %v1925_v28, 0.0 }
0x2ddd   :  { %1544 = vadd.xlane.f32.xlu0 %v1543_v29 }
0x2e66   :  { %v1545_v30 = vpop.xlane.xlu0 %1544 }
0x2e67   :  { %1926 = vrcp.f32 %v1545_v30 }
0x2e74   :  { %v1927_v31 = vpop.eup %1926 }
0x2e75   :  { %v1547_v32 = vmul.f32 %v1927_v31, %v1925_v28 }
0x2e77   :  { %1548 = vst.msk [vmem:[#allocation5] sm:$0x3] %vm1536_vm7, %v1547_v32 }
0x2e78   :  { %1939 = shalt.err (!%p1936_p4)
}
0x2e79   :  { %1558 = dma.vmem_to_hbm [thread:$0]  %s1556_s8, 32, %s2400_s10, [#allocation6]  }
0x2e7a   :  { %1948 = dma.done.wait [#allocation6], 32  }
0x2e7b   :  { %1949 = vsyncadd [#allocation6], 4294967264 }
0x2e7c   :  { %1562 = vsyncpa [#allocation6], 1 }

</bundles_post_ra>
